<compile_context>
chip_gen: v6e
topology: v6e:2x2x1
jax: 0.10.0
libtpu: 0.0.40
codegen_flags: <defaults>
</compile_context>

<pallas_src>
import math
import jax
import jax.numpy as jnp
from jax.experimental import pallas as pl
from jax.experimental.pallas import tpu as pltpu

# ---- model dimensions (small, consistent with the module's forward) ----
B, S = 2, 8
VOCAB = 32
D_MODEL = 32
N_HEADS = 4
D_HEAD = D_MODEL // N_HEADS
D_FF = 64
N_LAYERS = 2
N_CLASSES = 10
N_OUT_PAD = 128          # lane-dense generator output (real classes in [:N_CLASSES])
EPS = 1e-6
NEG_INF = -1e9


def _layer_norm(x, g, b):
    mu = jnp.mean(x, axis=-1, keepdims=True)
    var = jnp.mean((x - mu) ** 2, axis=-1, keepdims=True)
    return (x - mu) * jax.lax.rsqrt(var + EPS) * g + b


# ------------------------------------------------------------------
# Single fused kernel: N pre-LN encoder layers + final LN + mean-pool
# + generator (linear + log_softmax).  One batch element per grid step.
# ------------------------------------------------------------------
def transformer_kernel(x_ref, abias_ref,
                       wqkv_ref, bqkv_ref, wo_ref, lnb_ref,
                       w1_ref, b1_ref, w2_ref,
                       lnf_ref, wg_ref, bg_ref,
                       out_ref):
    x = x_ref[0].astype(jnp.float32)                     # (S, D)
    # additive mask bias, broadcast ONCE (jnp broadcasts are not CSE'd in loops)
    bias = jnp.broadcast_to(abias_ref[0], (S, S))        # (S, S)
    scale = 1.0 / math.sqrt(D_HEAD)

    for l in range(N_LAYERS):                            # static layer loop, weights stay in VMEM
        wqkv = wqkv_ref[l]                               # (D, 3D)  bf16
        bqkv = bqkv_ref[l]                               # (1, 3D)  f32
        wo = wo_ref[l]                                   # (D, D)   bf16
        lnb = lnb_ref[l]                                 # (6, D)   f32: ln1_g, ln1_b, ln2_g, ln2_b, bo, b2
        w1 = w1_ref[l]                                   # (D, DFF) bf16
        b1 = b1_ref[l]                                   # (1, DFF) f32
        w2 = w2_ref[l]                                   # (DFF, D) bf16

        ln1_g, ln1_b = lnb[0:1], lnb[1:2]
        ln2_g, ln2_b = lnb[2:3], lnb[3:4]
        bo, b2 = lnb[4:5], lnb[5:6]

        # ---- self-attention sublayer: x + MHSA(LN(x)) ----
        xn = _layer_norm(x, ln1_g, ln1_b)
        # single fused QKV projection: (S, D) @ (D, 3D)
        qkv = jnp.dot(xn.astype(jnp.bfloat16), wqkv,
                      preferred_element_type=jnp.float32) + bqkv        # (S, 3D)
        q = qkv[:, 0:D_MODEL] * scale                    # fold 1/sqrt(d_head) into Q once
        k = qkv[:, D_MODEL:2 * D_MODEL]
        v = qkv[:, 2 * D_MODEL:3 * D_MODEL]

        heads = []
        for h in range(N_HEADS):                         # static loop, contiguous lane slices
            sl = slice(h * D_HEAD, (h + 1) * D_HEAD)
            qh = q[:, sl].astype(jnp.bfloat16)
            kh = k[:, sl].astype(jnp.bfloat16)
            vh = v[:, sl].astype(jnp.bfloat16)
            scores = jnp.dot(qh, kh.T, preferred_element_type=jnp.float32) + bias
            m = jnp.max(scores, axis=-1, keepdims=True)
            p = jnp.exp(scores - m)
            p = p * pl.reciprocal(jnp.sum(p, axis=-1, keepdims=True), approx=True)
            heads.append(jnp.dot(p.astype(jnp.bfloat16), vh,
                                 preferred_element_type=jnp.float32))   # (S, D_HEAD)
        # concat(heads) @ W_o  -- single output-projection matmul
        attn = jnp.concatenate(heads, axis=-1)                           # (S, D)
        attn = jnp.dot(attn.astype(jnp.bfloat16), wo,
                       preferred_element_type=jnp.float32) + bo
        x = x + attn

        # ---- feedforward sublayer: x + FFN(LN(x)) ----
        xn2 = _layer_norm(x, ln2_g, ln2_b)
        h1 = jnp.dot(xn2.astype(jnp.bfloat16), w1,
                     preferred_element_type=jnp.float32) + b1
        h1 = jnp.maximum(h1, 0.0)
        h2 = jnp.dot(h1.astype(jnp.bfloat16), w2,
                     preferred_element_type=jnp.float32) + b2
        x = x + h2

    # ---- final LN + mean over seq (dim=1) + generator (linear + log_softmax) ----
    lnf = lnf_ref[...]                                                   # (2, D)
    xn = _layer_norm(x, lnf[0:1], lnf[1:2])
    pooled = jnp.mean(xn, axis=0, keepdims=True)                         # (1, D)
    # wg is zero-padded to 128 lanes; bg padded lanes hold NEG_INF so padded logits
    # contribute exp(~-1e9) == 0 to the log_softmax denominator.
    logits = jnp.dot(pooled.astype(jnp.bfloat16), wg_ref[...],
                     preferred_element_type=jnp.float32) + bg_ref[...]   # (1, 128)
    m = jnp.max(logits, axis=-1, keepdims=True)
    lse = jnp.log(jnp.sum(jnp.exp(logits - m), axis=-1, keepdims=True)) + m
    out_ref[0] = (logits - lse).astype(out_ref.dtype)                    # lane-dense log-probs


def _const_spec(shape):
    n = len(shape)
    return pl.BlockSpec(shape, lambda b, _n=n: (0,) * _n)


def fused_transformer_call(x, abias, pk):
    weights = [pk["wqkv"], pk["bqkv"], pk["wo"], pk["lnb"],
               pk["w1"], pk["b1"], pk["w2"],
               pk["lnf"], pk["wg"], pk["bg"]]
    in_specs = ([pl.BlockSpec((1, S, D_MODEL), lambda b: (b, 0, 0)),
                 pl.BlockSpec((1, 1, S), lambda b: (b, 0, 0))]
                + [_const_spec(w.shape) for w in weights])
    out = pl.pallas_call(
        transformer_kernel,
        out_shape=jax.ShapeDtypeStruct((B, 1, N_OUT_PAD), jnp.float32),
        grid=(B,),
        in_specs=in_specs,
        out_specs=pl.BlockSpec((1, 1, N_OUT_PAD), lambda b: (b, 0, 0)),
        compiler_params=pltpu.CompilerParams(dimension_semantics=("parallel",)),
    )(x, abias, *weights)
    return out[:, 0, :N_CLASSES]                                         # (B, N_CLASSES)


# ------------------------------------------------------------------
# Parameter init (deterministic), weight packing, and JAX glue
# (embedding gather + sinusoidal positional encoding).
# ------------------------------------------------------------------
def init_params(key):
    def nrm(k, shape, scale=0.02):
        return (scale * jax.random.normal(k, shape)).astype(jnp.float32)

    keys = jax.random.split(key, 4 + N_LAYERS)
    params = {
        "emb": nrm(keys[0], (VOCAB, D_MODEL), 1.0 / math.sqrt(D_MODEL)),
        "lnf_g": jnp.ones((1, D_MODEL), jnp.float32),
        "lnf_b": jnp.zeros((1, D_MODEL), jnp.float32),
        "wg": nrm(keys[1], (D_MODEL, N_CLASSES)),
        "bg": jnp.zeros((1, N_CLASSES), jnp.float32),
        "layers": [],
    }
    for l in range(N_LAYERS):
        lk = jax.random.split(keys[4 + l], 6)
        params["layers"].append({
            "wq": nrm(lk[0], (D_MODEL, D_MODEL)), "bq": jnp.zeros((1, D_MODEL), jnp.float32),
            "wk": nrm(lk[1], (D_MODEL, D_MODEL)), "bk": jnp.zeros((1, D_MODEL), jnp.float32),
            "wv": nrm(lk[2], (D_MODEL, D_MODEL)), "bv": jnp.zeros((1, D_MODEL), jnp.float32),
            "wo": nrm(lk[3], (D_MODEL, D_MODEL)), "bo": jnp.zeros((1, D_MODEL), jnp.float32),
            "ln1_g": jnp.ones((1, D_MODEL), jnp.float32), "ln1_b": jnp.zeros((1, D_MODEL), jnp.float32),
            "ln2_g": jnp.ones((1, D_MODEL), jnp.float32), "ln2_b": jnp.zeros((1, D_MODEL), jnp.float32),
            "w1": nrm(lk[4], (D_MODEL, D_FF)), "b1": jnp.zeros((1, D_FF), jnp.float32),
            "w2": nrm(lk[5], (D_FF, D_MODEL)), "b2": jnp.zeros((1, D_MODEL), jnp.float32),
        })
    return params


def pack_params(params):
    layers = params["layers"]
    # large matrices: bf16 MXU inputs (f32 accumulation inside the kernel)
    wqkv = jnp.stack([jnp.concatenate([lp["wq"], lp["wk"], lp["wv"]], axis=1)
                      for lp in layers]).astype(jnp.bfloat16)                 # (L, D, 3D)
    wo = jnp.stack([lp["wo"] for lp in layers]).astype(jnp.bfloat16)          # (L, D, D)
    w1 = jnp.stack([lp["w1"] for lp in layers]).astype(jnp.bfloat16)          # (L, D, DFF)
    w2 = jnp.stack([lp["w2"] for lp in layers]).astype(jnp.bfloat16)          # (L, DFF, D)
    # small vectors packed into a few f32 blocks
    bqkv = jnp.stack([jnp.concatenate([lp["bq"], lp["bk"], lp["bv"]], axis=1)
                      for lp in layers])                                      # (L, 1, 3D)
    lnb = jnp.stack([jnp.concatenate([lp["ln1_g"], lp["ln1_b"],
                                      lp["ln2_g"], lp["ln2_b"],
                                      lp["bo"], lp["b2"]], axis=0)
                     for lp in layers])                                       # (L, 6, D)
    b1 = jnp.stack([lp["b1"] for lp in layers])                               # (L, 1, DFF)
    lnf = jnp.concatenate([params["lnf_g"], params["lnf_b"]], axis=0)         # (2, D)
    # lane-dense generator: pad weight with zeros, pad bias with NEG_INF
    wg = jnp.zeros((D_MODEL, N_OUT_PAD), jnp.bfloat16)
    wg = wg.at[:, :N_CLASSES].set(params["wg"].astype(jnp.bfloat16))          # (D, 128)
    bg = jnp.full((1, N_OUT_PAD), NEG_INF, jnp.float32)
    bg = bg.at[:, :N_CLASSES].set(params["bg"])                               # (1, 128)
    return {"wqkv": wqkv, "bqkv": bqkv, "wo": wo, "lnb": lnb,
            "w1": w1, "b1": b1, "w2": w2, "lnf": lnf, "wg": wg, "bg": bg}


def positional_encoding(seq_len, d_model):
    pos = jnp.arange(seq_len, dtype=jnp.float32)[:, None]
    i = jnp.arange(0, d_model, 2, dtype=jnp.float32)
    div = jnp.exp(-math.log(10000.0) * i / d_model)
    pe = jnp.zeros((seq_len, d_model), jnp.float32)
    pe = pe.at[:, 0::2].set(jnp.sin(pos * div))
    pe = pe.at[:, 1::2].set(jnp.cos(pos * div))
    return pe


@jax.jit
def transformer_forward(params, src, src_mask):
    # src_embed: embedding gather (JAX glue) * sqrt(d_model) + positional encoding
    # TODO(synk): token-id gather kept in JAX; a Pallas DMA-gather is not worth it at this size.
    x = params["emb"][src] * math.sqrt(D_MODEL) + positional_encoding(S, D_MODEL)[None, :, :]
    x = x.astype(jnp.float32)
    # additive attention-mask bias, hoisted out of the kernel's head loop
    abias = (1.0 - src_mask.astype(jnp.float32)) * NEG_INF               # (B, 1, S)
    packed = pack_params(params)
    # single fused pallas_call: encoder stack + final LN + mean(dim=1) + generator + log_softmax
    return fused_transformer_call(x, abias, packed)


if __name__ == "__main__":
    key = jax.random.PRNGKey(0)
    pkey, skey = jax.random.split(key)
    params = init_params(pkey)

    src = jax.random.randint(skey, (B, S), 0, VOCAB)                      # token ids
    lengths = jnp.array([S, S - 3], jnp.int32)                            # second sequence padded
    src_mask = (jnp.arange(S)[None, :] < lengths[:, None]).astype(jnp.float32)
    src_mask = src_mask.reshape(B, 1, S)                                  # [B, 1, S]

    out = transformer_forward(params, src, src_mask)                      # [B, N_CLASSES] log-probs
    out = jax.block_until_ready(out)
    assert out.shape == (B, N_CLASSES)
    assert bool(jnp.all(jnp.isfinite(out)))
    print("KERNEL_OK")
</pallas_src>

<mosaic_0001>
module attributes {stable_mosaic.version = 11 : i64} {
  func.func @transformer_kernel(%arg0: i32, %arg1: memref<1x8x32xf32, #tpu.memory_space<vmem>>, %arg2: memref<1x1x8xf32, #tpu.memory_space<vmem>>, %arg3: memref<2x32x96xbf16, #tpu.memory_space<vmem>>, %arg4: memref<2x1x96xf32, #tpu.memory_space<vmem>>, %arg5: memref<2x32x32xbf16, #tpu.memory_space<vmem>>, %arg6: memref<2x6x32xf32, #tpu.memory_space<vmem>>, %arg7: memref<2x32x64xbf16, #tpu.memory_space<vmem>>, %arg8: memref<2x1x64xf32, #tpu.memory_space<vmem>>, %arg9: memref<2x64x32xbf16, #tpu.memory_space<vmem>>, %arg10: memref<2x32xf32, #tpu.memory_space<vmem>>, %arg11: memref<32x128xbf16, #tpu.memory_space<vmem>>, %arg12: memref<1x128xf32, #tpu.memory_space<vmem>>, %arg13: memref<1x1x128xf32, #tpu.memory_space<vmem>>) attributes {dimension_semantics = [#tpu.dimension_semantics<parallel>], iteration_bounds = array<i64: 2>, scalar_prefetch = 0 : i64, scratch_operands = 0 : i64, tpu.core_type = #tpu.core_type<tc>, window_params = [{transform_indices = @transform_0, window_bounds = array<i64: 1, 8, 32>}, {transform_indices = @transform_1, window_bounds = array<i64: 1, 1, 8>}, {pipeline_mode = #tpu.pipeline_mode<synchronous>, transform_indices = @transform_2, window_bounds = array<i64: 2, 32, 96>}, {pipeline_mode = #tpu.pipeline_mode<synchronous>, transform_indices = @transform_3, window_bounds = array<i64: 2, 1, 96>}, {pipeline_mode = #tpu.pipeline_mode<synchronous>, transform_indices = @transform_4, window_bounds = array<i64: 2, 32, 32>}, {pipeline_mode = #tpu.pipeline_mode<synchronous>, transform_indices = @transform_5, window_bounds = array<i64: 2, 6, 32>}, {pipeline_mode = #tpu.pipeline_mode<synchronous>, transform_indices = @transform_6, window_bounds = array<i64: 2, 32, 64>}, {pipeline_mode = #tpu.pipeline_mode<synchronous>, transform_indices = @transform_7, window_bounds = array<i64: 2, 1, 64>}, {pipeline_mode = #tpu.pipeline_mode<synchronous>, transform_indices = @transform_8, window_bounds = array<i64: 2, 64, 32>}, {pipeline_mode = #tpu.pipeline_mode<synchronous>, transform_indices = @transform_9, window_bounds = array<i64: 2, 32>}, {pipeline_mode = #tpu.pipeline_mode<synchronous>, transform_indices = @transform_10, window_bounds = array<i64: 32, 128>}, {pipeline_mode = #tpu.pipeline_mode<synchronous>, transform_indices = @transform_11, window_bounds = array<i64: 1, 128>}, {transform_indices = @transform_12, window_bounds = array<i64: 1, 1, 128>}]} {
    %c0 = arith.constant 0 : index
    %c0_0 = arith.constant 0 : index
    %c0_1 = arith.constant 0 : index
    %0 = vector.load %arg1[%c0, %c0_0, %c0_1] : memref<1x8x32xf32, #tpu.memory_space<vmem>>, vector<1x8x32xf32>
    %1 = vector.shape_cast %0 : vector<1x8x32xf32> to vector<8x32xf32>
    %c0_2 = arith.constant 0 : index
    %c0_3 = arith.constant 0 : index
    %c0_4 = arith.constant 0 : index
    %2 = vector.load %arg2[%c0_2, %c0_3, %c0_4] : memref<1x1x8xf32, #tpu.memory_space<vmem>>, vector<1x1x8xf32>
    %3 = vector.shape_cast %2 : vector<1x1x8xf32> to vector<1x8xf32>
    %4 = vector.shape_cast %3 : vector<1x8xf32> to vector<1x8xf32>
    %5 = vector.broadcast %4 : vector<1x8xf32> to vector<8x8xf32>
    %c0_5 = arith.constant 0 : index
    %c0_6 = arith.constant 0 : index
    %c0_7 = arith.constant 0 : index
    %6 = vector.load %arg3[%c0_5, %c0_6, %c0_7] : memref<2x32x96xbf16, #tpu.memory_space<vmem>>, vector<1x32x96xbf16>
    %7 = vector.shape_cast %6 : vector<1x32x96xbf16> to vector<32x96xbf16>
    %c0_8 = arith.constant 0 : index
    %c0_9 = arith.constant 0 : index
    %c0_10 = arith.constant 0 : index
    %8 = vector.load %arg4[%c0_8, %c0_9, %c0_10] : memref<2x1x96xf32, #tpu.memory_space<vmem>>, vector<1x1x96xf32>
    %9 = vector.shape_cast %8 : vector<1x1x96xf32> to vector<1x96xf32>
    %c0_11 = arith.constant 0 : index
    %c0_12 = arith.constant 0 : index
    %c0_13 = arith.constant 0 : index
    %10 = vector.load %arg5[%c0_11, %c0_12, %c0_13] : memref<2x32x32xbf16, #tpu.memory_space<vmem>>, vector<1x32x32xbf16>
    %11 = vector.shape_cast %10 : vector<1x32x32xbf16> to vector<32x32xbf16>
    %c0_14 = arith.constant 0 : index
    %c0_15 = arith.constant 0 : index
    %c0_16 = arith.constant 0 : index
    %12 = vector.load %arg6[%c0_14, %c0_15, %c0_16] : memref<2x6x32xf32, #tpu.memory_space<vmem>>, vector<1x6x32xf32>
    %13 = vector.shape_cast %12 : vector<1x6x32xf32> to vector<6x32xf32>
    %c0_17 = arith.constant 0 : index
    %c0_18 = arith.constant 0 : index
    %c0_19 = arith.constant 0 : index
    %14 = vector.load %arg7[%c0_17, %c0_18, %c0_19] : memref<2x32x64xbf16, #tpu.memory_space<vmem>>, vector<1x32x64xbf16>
    %15 = vector.shape_cast %14 : vector<1x32x64xbf16> to vector<32x64xbf16>
    %c0_20 = arith.constant 0 : index
    %c0_21 = arith.constant 0 : index
    %c0_22 = arith.constant 0 : index
    %16 = vector.load %arg8[%c0_20, %c0_21, %c0_22] : memref<2x1x64xf32, #tpu.memory_space<vmem>>, vector<1x1x64xf32>
    %17 = vector.shape_cast %16 : vector<1x1x64xf32> to vector<1x64xf32>
    %c0_23 = arith.constant 0 : index
    %c0_24 = arith.constant 0 : index
    %c0_25 = arith.constant 0 : index
    %18 = vector.load %arg9[%c0_23, %c0_24, %c0_25] : memref<2x64x32xbf16, #tpu.memory_space<vmem>>, vector<1x64x32xbf16>
    %19 = vector.shape_cast %18 : vector<1x64x32xbf16> to vector<64x32xbf16>
    %20 = vector.extract_strided_slice %13 {offsets = [0, 0], sizes = [1, 32], strides = [1, 1]} : vector<6x32xf32> to vector<1x32xf32>
    %21 = vector.extract_strided_slice %13 {offsets = [1, 0], sizes = [1, 32], strides = [1, 1]} : vector<6x32xf32> to vector<1x32xf32>
    %22 = vector.extract_strided_slice %13 {offsets = [2, 0], sizes = [1, 32], strides = [1, 1]} : vector<6x32xf32> to vector<1x32xf32>
    %23 = vector.extract_strided_slice %13 {offsets = [3, 0], sizes = [1, 32], strides = [1, 1]} : vector<6x32xf32> to vector<1x32xf32>
    %24 = vector.extract_strided_slice %13 {offsets = [4, 0], sizes = [1, 32], strides = [1, 1]} : vector<6x32xf32> to vector<1x32xf32>
    %25 = vector.extract_strided_slice %13 {offsets = [5, 0], sizes = [1, 32], strides = [1, 1]} : vector<6x32xf32> to vector<1x32xf32>
    %cst = arith.constant dense<0.000000e+00> : vector<8xf32>
    %26 = vector.multi_reduction <add>, %1, %cst [1] : vector<8x32xf32> to vector<8xf32>
    %27 = vector.shape_cast %26 : vector<8xf32> to vector<8x1xf32>
    %cst_26 = arith.constant 3.200000e+01 : f32
    %28 = vector.broadcast %cst_26 : f32 to vector<8x1xf32>
    %29 = arith.divf %27, %28 : vector<8x1xf32>
    %30 = vector.broadcast %29 : vector<8x1xf32> to vector<8x32xf32>
    %31 = arith.subf %1, %30 : vector<8x32xf32>
    %32 = arith.mulf %31, %31 : vector<8x32xf32>
    %cst_27 = arith.constant dense<0.000000e+00> : vector<8xf32>
    %33 = vector.multi_reduction <add>, %32, %cst_27 [1] : vector<8x32xf32> to vector<8xf32>
    %34 = vector.shape_cast %33 : vector<8xf32> to vector<8x1xf32>
    %cst_28 = arith.constant 3.200000e+01 : f32
    %35 = vector.broadcast %cst_28 : f32 to vector<8x1xf32>
    %36 = arith.divf %34, %35 : vector<8x1xf32>
    %37 = vector.broadcast %29 : vector<8x1xf32> to vector<8x32xf32>
    %38 = arith.subf %1, %37 : vector<8x32xf32>
    %cst_29 = arith.constant 9.99999997E-7 : f32
    %39 = vector.broadcast %cst_29 : f32 to vector<8x1xf32>
    %40 = arith.addf %36, %39 : vector<8x1xf32>
    %41 = math.rsqrt %40 : vector<8x1xf32>
    %42 = vector.broadcast %41 : vector<8x1xf32> to vector<8x32xf32>
    %43 = arith.mulf %38, %42 : vector<8x32xf32>
    %44 = vector.broadcast %20 : vector<1x32xf32> to vector<8x32xf32>
    %45 = arith.mulf %43, %44 : vector<8x32xf32>
    %46 = vector.broadcast %21 : vector<1x32xf32> to vector<8x32xf32>
    %47 = arith.addf %45, %46 : vector<8x32xf32>
    %48 = arith.truncf %47 : vector<8x32xf32> to vector<8x32xbf16>
    %cst_30 = arith.constant dense<0.000000e+00> : vector<8x96xf32>
    %49 = tpu.matmul %48, %7, %cst_30 {dimension_numbers = #tpu.dot_dimension_numbers<[1], [0], [0], [1], [0, 0, 1, 1], [], []>} : vector<8x32xbf16>, vector<32x96xbf16>, vector<8x96xf32> -> vector<8x96xf32>
    %50 = vector.broadcast %9 : vector<1x96xf32> to vector<8x96xf32>
    %51 = arith.addf %49, %50 : vector<8x96xf32>
    %52 = vector.extract_strided_slice %51 {offsets = [0, 0], sizes = [8, 32], strides = [1, 1]} : vector<8x96xf32> to vector<8x32xf32>
    %cst_31 = arith.constant 0.353553385 : f32
    %53 = vector.broadcast %cst_31 : f32 to vector<8x32xf32>
    %54 = arith.mulf %52, %53 : vector<8x32xf32>
    %55 = vector.extract_strided_slice %51 {offsets = [0, 32], sizes = [8, 32], strides = [1, 1]} : vector<8x96xf32> to vector<8x32xf32>
    %56 = vector.extract_strided_slice %51 {offsets = [0, 64], sizes = [8, 32], strides = [1, 1]} : vector<8x96xf32> to vector<8x32xf32>
    %57 = vector.extract_strided_slice %54 {offsets = [0, 0], sizes = [8, 8], strides = [1, 1]} : vector<8x32xf32> to vector<8x8xf32>
    %58 = arith.truncf %57 : vector<8x8xf32> to vector<8x8xbf16>
    %59 = vector.extract_strided_slice %55 {offsets = [0, 0], sizes = [8, 8], strides = [1, 1]} : vector<8x32xf32> to vector<8x8xf32>
    %60 = arith.truncf %59 : vector<8x8xf32> to vector<8x8xbf16>
    %61 = vector.extract_strided_slice %56 {offsets = [0, 0], sizes = [8, 8], strides = [1, 1]} : vector<8x32xf32> to vector<8x8xf32>
    %62 = arith.truncf %61 : vector<8x8xf32> to vector<8x8xbf16>
    %63 = tpu.transpose %60, [1, 0] : vector<8x8xbf16> -> vector<8x8xbf16>
    %cst_32 = arith.constant dense<0.000000e+00> : vector<8x8xf32>
    %64 = tpu.matmul %58, %63, %cst_32 {dimension_numbers = #tpu.dot_dimension_numbers<[1], [0], [0], [1], [0, 0, 1, 1], [], []>} : vector<8x8xbf16>, vector<8x8xbf16>, vector<8x8xf32> -> vector<8x8xf32>
    %65 = arith.addf %64, %5 : vector<8x8xf32>
    %cst_33 = arith.constant dense<0xFF800000> : vector<8xf32>
    %66 = vector.multi_reduction <maximumf>, %65, %cst_33 [1] : vector<8x8xf32> to vector<8xf32>
    %67 = vector.shape_cast %66 : vector<8xf32> to vector<8x1xf32>
    %68 = vector.broadcast %67 : vector<8x1xf32> to vector<8x8xf32>
    %69 = arith.subf %65, %68 : vector<8x8xf32>
    %70 = math.exp %69 : vector<8x8xf32>
    %cst_34 = arith.constant dense<0.000000e+00> : vector<8xf32>
    %71 = vector.multi_reduction <add>, %70, %cst_34 [1] : vector<8x8xf32> to vector<8xf32>
    %72 = vector.shape_cast %71 : vector<8xf32> to vector<8x1xf32>
    %73 = tpu.reciprocal %72 {approx = true} : vector<8x1xf32> -> vector<8x1xf32>
    %74 = vector.broadcast %73 : vector<8x1xf32> to vector<8x8xf32>
    %75 = arith.mulf %70, %74 : vector<8x8xf32>
    %76 = arith.truncf %75 : vector<8x8xf32> to vector<8x8xbf16>
    %cst_35 = arith.constant dense<0.000000e+00> : vector<8x8xf32>
    %77 = tpu.matmul %76, %62, %cst_35 {dimension_numbers = #tpu.dot_dimension_numbers<[1], [0], [0], [1], [0, 0, 1, 1], [], []>} : vector<8x8xbf16>, vector<8x8xbf16>, vector<8x8xf32> -> vector<8x8xf32>
    %78 = vector.extract_strided_slice %54 {offsets = [0, 8], sizes = [8, 8], strides = [1, 1]} : vector<8x32xf32> to vector<8x8xf32>
    %79 = arith.truncf %78 : vector<8x8xf32> to vector<8x8xbf16>
    %80 = vector.extract_strided_slice %55 {offsets = [0, 8], sizes = [8, 8], strides = [1, 1]} : vector<8x32xf32> to vector<8x8xf32>
    %81 = arith.truncf %80 : vector<8x8xf32> to vector<8x8xbf16>
    %82 = vector.extract_strided_slice %56 {offsets = [0, 8], sizes = [8, 8], strides = [1, 1]} : vector<8x32xf32> to vector<8x8xf32>
    %83 = arith.truncf %82 : vector<8x8xf32> to vector<8x8xbf16>
    %84 = tpu.transpose %81, [1, 0] : vector<8x8xbf16> -> vector<8x8xbf16>
    %cst_36 = arith.constant dense<0.000000e+00> : vector<8x8xf32>
    %85 = tpu.matmul %79, %84, %cst_36 {dimension_numbers = #tpu.dot_dimension_numbers<[1], [0], [0], [1], [0, 0, 1, 1], [], []>} : vector<8x8xbf16>, vector<8x8xbf16>, vector<8x8xf32> -> vector<8x8xf32>
    %86 = arith.addf %85, %5 : vector<8x8xf32>
    %cst_37 = arith.constant dense<0xFF800000> : vector<8xf32>
    %87 = vector.multi_reduction <maximumf>, %86, %cst_37 [1] : vector<8x8xf32> to vector<8xf32>
    %88 = vector.shape_cast %87 : vector<8xf32> to vector<8x1xf32>
    %89 = vector.broadcast %88 : vector<8x1xf32> to vector<8x8xf32>
    %90 = arith.subf %86, %89 : vector<8x8xf32>
    %91 = math.exp %90 : vector<8x8xf32>
    %cst_38 = arith.constant dense<0.000000e+00> : vector<8xf32>
    %92 = vector.multi_reduction <add>, %91, %cst_38 [1] : vector<8x8xf32> to vector<8xf32>
    %93 = vector.shape_cast %92 : vector<8xf32> to vector<8x1xf32>
    %94 = tpu.reciprocal %93 {approx = true} : vector<8x1xf32> -> vector<8x1xf32>
    %95 = vector.broadcast %94 : vector<8x1xf32> to vector<8x8xf32>
    %96 = arith.mulf %91, %95 : vector<8x8xf32>
    %97 = arith.truncf %96 : vector<8x8xf32> to vector<8x8xbf16>
    %cst_39 = arith.constant dense<0.000000e+00> : vector<8x8xf32>
    %98 = tpu.matmul %97, %83, %cst_39 {dimension_numbers = #tpu.dot_dimension_numbers<[1], [0], [0], [1], [0, 0, 1, 1], [], []>} : vector<8x8xbf16>, vector<8x8xbf16>, vector<8x8xf32> -> vector<8x8xf32>
    %99 = vector.extract_strided_slice %54 {offsets = [0, 16], sizes = [8, 8], strides = [1, 1]} : vector<8x32xf32> to vector<8x8xf32>
    %100 = arith.truncf %99 : vector<8x8xf32> to vector<8x8xbf16>
    %101 = vector.extract_strided_slice %55 {offsets = [0, 16], sizes = [8, 8], strides = [1, 1]} : vector<8x32xf32> to vector<8x8xf32>
    %102 = arith.truncf %101 : vector<8x8xf32> to vector<8x8xbf16>
    %103 = vector.extract_strided_slice %56 {offsets = [0, 16], sizes = [8, 8], strides = [1, 1]} : vector<8x32xf32> to vector<8x8xf32>
    %104 = arith.truncf %103 : vector<8x8xf32> to vector<8x8xbf16>
    %105 = tpu.transpose %102, [1, 0] : vector<8x8xbf16> -> vector<8x8xbf16>
    %cst_40 = arith.constant dense<0.000000e+00> : vector<8x8xf32>
    %106 = tpu.matmul %100, %105, %cst_40 {dimension_numbers = #tpu.dot_dimension_numbers<[1], [0], [0], [1], [0, 0, 1, 1], [], []>} : vector<8x8xbf16>, vector<8x8xbf16>, vector<8x8xf32> -> vector<8x8xf32>
    %107 = arith.addf %106, %5 : vector<8x8xf32>
    %cst_41 = arith.constant dense<0xFF800000> : vector<8xf32>
    %108 = vector.multi_reduction <maximumf>, %107, %cst_41 [1] : vector<8x8xf32> to vector<8xf32>
    %109 = vector.shape_cast %108 : vector<8xf32> to vector<8x1xf32>
    %110 = vector.broadcast %109 : vector<8x1xf32> to vector<8x8xf32>
    %111 = arith.subf %107, %110 : vector<8x8xf32>
    %112 = math.exp %111 : vector<8x8xf32>
    %cst_42 = arith.constant dense<0.000000e+00> : vector<8xf32>
    %113 = vector.multi_reduction <add>, %112, %cst_42 [1] : vector<8x8xf32> to vector<8xf32>
    %114 = vector.shape_cast %113 : vector<8xf32> to vector<8x1xf32>
    %115 = tpu.reciprocal %114 {approx = true} : vector<8x1xf32> -> vector<8x1xf32>
    %116 = vector.broadcast %115 : vector<8x1xf32> to vector<8x8xf32>
    %117 = arith.mulf %112, %116 : vector<8x8xf32>
    %118 = arith.truncf %117 : vector<8x8xf32> to vector<8x8xbf16>
    %cst_43 = arith.constant dense<0.000000e+00> : vector<8x8xf32>
    %119 = tpu.matmul %118, %104, %cst_43 {dimension_numbers = #tpu.dot_dimension_numbers<[1], [0], [0], [1], [0, 0, 1, 1], [], []>} : vector<8x8xbf16>, vector<8x8xbf16>, vector<8x8xf32> -> vector<8x8xf32>
    %120 = vector.extract_strided_slice %54 {offsets = [0, 24], sizes = [8, 8], strides = [1, 1]} : vector<8x32xf32> to vector<8x8xf32>
    %121 = arith.truncf %120 : vector<8x8xf32> to vector<8x8xbf16>
    %122 = vector.extract_strided_slice %55 {offsets = [0, 24], sizes = [8, 8], strides = [1, 1]} : vector<8x32xf32> to vector<8x8xf32>
    %123 = arith.truncf %122 : vector<8x8xf32> to vector<8x8xbf16>
    %124 = vector.extract_strided_slice %56 {offsets = [0, 24], sizes = [8, 8], strides = [1, 1]} : vector<8x32xf32> to vector<8x8xf32>
    %125 = arith.truncf %124 : vector<8x8xf32> to vector<8x8xbf16>
    %126 = tpu.transpose %123, [1, 0] : vector<8x8xbf16> -> vector<8x8xbf16>
    %cst_44 = arith.constant dense<0.000000e+00> : vector<8x8xf32>
    %127 = tpu.matmul %121, %126, %cst_44 {dimension_numbers = #tpu.dot_dimension_numbers<[1], [0], [0], [1], [0, 0, 1, 1], [], []>} : vector<8x8xbf16>, vector<8x8xbf16>, vector<8x8xf32> -> vector<8x8xf32>
    %128 = arith.addf %127, %5 : vector<8x8xf32>
    %cst_45 = arith.constant dense<0xFF800000> : vector<8xf32>
    %129 = vector.multi_reduction <maximumf>, %128, %cst_45 [1] : vector<8x8xf32> to vector<8xf32>
    %130 = vector.shape_cast %129 : vector<8xf32> to vector<8x1xf32>
    %131 = vector.broadcast %130 : vector<8x1xf32> to vector<8x8xf32>
    %132 = arith.subf %128, %131 : vector<8x8xf32>
    %133 = math.exp %132 : vector<8x8xf32>
    %cst_46 = arith.constant dense<0.000000e+00> : vector<8xf32>
    %134 = vector.multi_reduction <add>, %133, %cst_46 [1] : vector<8x8xf32> to vector<8xf32>
    %135 = vector.shape_cast %134 : vector<8xf32> to vector<8x1xf32>
    %136 = tpu.reciprocal %135 {approx = true} : vector<8x1xf32> -> vector<8x1xf32>
    %137 = vector.broadcast %136 : vector<8x1xf32> to vector<8x8xf32>
    %138 = arith.mulf %133, %137 : vector<8x8xf32>
    %139 = arith.truncf %138 : vector<8x8xf32> to vector<8x8xbf16>
    %cst_47 = arith.constant dense<0.000000e+00> : vector<8x8xf32>
    %140 = tpu.matmul %139, %125, %cst_47 {dimension_numbers = #tpu.dot_dimension_numbers<[1], [0], [0], [1], [0, 0, 1, 1], [], []>} : vector<8x8xbf16>, vector<8x8xbf16>, vector<8x8xf32> -> vector<8x8xf32>
    %141 = tpu.concatenate %77, %98, %119, %140 in 1 : vector<8x8xf32>, vector<8x8xf32>, vector<8x8xf32>, vector<8x8xf32> -> vector<8x32xf32>
    %142 = arith.truncf %141 : vector<8x32xf32> to vector<8x32xbf16>
    %cst_48 = arith.constant dense<0.000000e+00> : vector<8x32xf32>
    %143 = tpu.matmul %142, %11, %cst_48 {dimension_numbers = #tpu.dot_dimension_numbers<[1], [0], [0], [1], [0, 0, 1, 1], [], []>} : vector<8x32xbf16>, vector<32x32xbf16>, vector<8x32xf32> -> vector<8x32xf32>
    %144 = vector.broadcast %24 : vector<1x32xf32> to vector<8x32xf32>
    %145 = arith.addf %143, %144 : vector<8x32xf32>
    %146 = arith.addf %1, %145 : vector<8x32xf32>
    %cst_49 = arith.constant dense<0.000000e+00> : vector<8xf32>
    %147 = vector.multi_reduction <add>, %146, %cst_49 [1] : vector<8x32xf32> to vector<8xf32>
    %148 = vector.shape_cast %147 : vector<8xf32> to vector<8x1xf32>
    %cst_50 = arith.constant 3.200000e+01 : f32
    %149 = vector.broadcast %cst_50 : f32 to vector<8x1xf32>
    %150 = arith.divf %148, %149 : vector<8x1xf32>
    %151 = vector.broadcast %150 : vector<8x1xf32> to vector<8x32xf32>
    %152 = arith.subf %146, %151 : vector<8x32xf32>
    %153 = arith.mulf %152, %152 : vector<8x32xf32>
    %cst_51 = arith.constant dense<0.000000e+00> : vector<8xf32>
    %154 = vector.multi_reduction <add>, %153, %cst_51 [1] : vector<8x32xf32> to vector<8xf32>
    %155 = vector.shape_cast %154 : vector<8xf32> to vector<8x1xf32>
    %cst_52 = arith.constant 3.200000e+01 : f32
    %156 = vector.broadcast %cst_52 : f32 to vector<8x1xf32>
    %157 = arith.divf %155, %156 : vector<8x1xf32>
    %158 = vector.broadcast %150 : vector<8x1xf32> to vector<8x32xf32>
    %159 = arith.subf %146, %158 : vector<8x32xf32>
    %cst_53 = arith.constant 9.99999997E-7 : f32
    %160 = vector.broadcast %cst_53 : f32 to vector<8x1xf32>
    %161 = arith.addf %157, %160 : vector<8x1xf32>
    %162 = math.rsqrt %161 : vector<8x1xf32>
    %163 = vector.broadcast %162 : vector<8x1xf32> to vector<8x32xf32>
    %164 = arith.mulf %159, %163 : vector<8x32xf32>
    %165 = vector.broadcast %22 : vector<1x32xf32> to vector<8x32xf32>
    %166 = arith.mulf %164, %165 : vector<8x32xf32>
    %167 = vector.broadcast %23 : vector<1x32xf32> to vector<8x32xf32>
    %168 = arith.addf %166, %167 : vector<8x32xf32>
    %169 = arith.truncf %168 : vector<8x32xf32> to vector<8x32xbf16>
    %cst_54 = arith.constant dense<0.000000e+00> : vector<8x64xf32>
    %170 = tpu.matmul %169, %15, %cst_54 {dimension_numbers = #tpu.dot_dimension_numbers<[1], [0], [0], [1], [0, 0, 1, 1], [], []>} : vector<8x32xbf16>, vector<32x64xbf16>, vector<8x64xf32> -> vector<8x64xf32>
    %171 = vector.broadcast %17 : vector<1x64xf32> to vector<8x64xf32>
    %172 = arith.addf %170, %171 : vector<8x64xf32>
    %cst_55 = arith.constant 0.000000e+00 : f32
    %173 = vector.broadcast %cst_55 : f32 to vector<8x64xf32>
    %174 = arith.maximumf %172, %173 : vector<8x64xf32>
    %175 = arith.truncf %174 : vector<8x64xf32> to vector<8x64xbf16>
    %cst_56 = arith.constant dense<0.000000e+00> : vector<8x32xf32>
    %176 = tpu.matmul %175, %19, %cst_56 {dimension_numbers = #tpu.dot_dimension_numbers<[1], [0], [0], [1], [0, 0, 1, 1], [], []>} : vector<8x64xbf16>, vector<64x32xbf16>, vector<8x32xf32> -> vector<8x32xf32>
    %177 = vector.broadcast %25 : vector<1x32xf32> to vector<8x32xf32>
    %178 = arith.addf %176, %177 : vector<8x32xf32>
    %179 = arith.addf %146, %178 : vector<8x32xf32>
    %c1 = arith.constant 1 : index
    %c0_57 = arith.constant 0 : index
    %c0_58 = arith.constant 0 : index
    %180 = vector.load %arg3[%c1, %c0_57, %c0_58] : memref<2x32x96xbf16, #tpu.memory_space<vmem>>, vector<1x32x96xbf16>
    %181 = vector.shape_cast %180 : vector<1x32x96xbf16> to vector<32x96xbf16>
    %c1_59 = arith.constant 1 : index
    %c0_60 = arith.constant 0 : index
    %c0_61 = arith.constant 0 : index
    %182 = vector.load %arg4[%c1_59, %c0_60, %c0_61] : memref<2x1x96xf32, #tpu.memory_space<vmem>>, vector<1x1x96xf32>
    %183 = vector.shape_cast %182 : vector<1x1x96xf32> to vector<1x96xf32>
    %c1_62 = arith.constant 1 : index
    %c0_63 = arith.constant 0 : index
    %c0_64 = arith.constant 0 : index
    %184 = vector.load %arg5[%c1_62, %c0_63, %c0_64] : memref<2x32x32xbf16, #tpu.memory_space<vmem>>, vector<1x32x32xbf16>
    %185 = vector.shape_cast %184 : vector<1x32x32xbf16> to vector<32x32xbf16>
    %c1_65 = arith.constant 1 : index
    %c0_66 = arith.constant 0 : index
    %c0_67 = arith.constant 0 : index
    %186 = vector.load %arg6[%c1_65, %c0_66, %c0_67] : memref<2x6x32xf32, #tpu.memory_space<vmem>>, vector<1x6x32xf32>
    %187 = vector.shape_cast %186 : vector<1x6x32xf32> to vector<6x32xf32>
    %c1_68 = arith.constant 1 : index
    %c0_69 = arith.constant 0 : index
    %c0_70 = arith.constant 0 : index
    %188 = vector.load %arg7[%c1_68, %c0_69, %c0_70] : memref<2x32x64xbf16, #tpu.memory_space<vmem>>, vector<1x32x64xbf16>
    %189 = vector.shape_cast %188 : vector<1x32x64xbf16> to vector<32x64xbf16>
    %c1_71 = arith.constant 1 : index
    %c0_72 = arith.constant 0 : index
    %c0_73 = arith.constant 0 : index
    %190 = vector.load %arg8[%c1_71, %c0_72, %c0_73] : memref<2x1x64xf32, #tpu.memory_space<vmem>>, vector<1x1x64xf32>
    %191 = vector.shape_cast %190 : vector<1x1x64xf32> to vector<1x64xf32>
    %c1_74 = arith.constant 1 : index
    %c0_75 = arith.constant 0 : index
    %c0_76 = arith.constant 0 : index
    %192 = vector.load %arg9[%c1_74, %c0_75, %c0_76] : memref<2x64x32xbf16, #tpu.memory_space<vmem>>, vector<1x64x32xbf16>
    %193 = vector.shape_cast %192 : vector<1x64x32xbf16> to vector<64x32xbf16>
    %194 = vector.extract_strided_slice %187 {offsets = [0, 0], sizes = [1, 32], strides = [1, 1]} : vector<6x32xf32> to vector<1x32xf32>
    %195 = vector.extract_strided_slice %187 {offsets = [1, 0], sizes = [1, 32], strides = [1, 1]} : vector<6x32xf32> to vector<1x32xf32>
    %196 = vector.extract_strided_slice %187 {offsets = [2, 0], sizes = [1, 32], strides = [1, 1]} : vector<6x32xf32> to vector<1x32xf32>
    %197 = vector.extract_strided_slice %187 {offsets = [3, 0], sizes = [1, 32], strides = [1, 1]} : vector<6x32xf32> to vector<1x32xf32>
    %198 = vector.extract_strided_slice %187 {offsets = [4, 0], sizes = [1, 32], strides = [1, 1]} : vector<6x32xf32> to vector<1x32xf32>
    %199 = vector.extract_strided_slice %187 {offsets = [5, 0], sizes = [1, 32], strides = [1, 1]} : vector<6x32xf32> to vector<1x32xf32>
    %cst_77 = arith.constant dense<0.000000e+00> : vector<8xf32>
    %200 = vector.multi_reduction <add>, %179, %cst_77 [1] : vector<8x32xf32> to vector<8xf32>
    %201 = vector.shape_cast %200 : vector<8xf32> to vector<8x1xf32>
    %cst_78 = arith.constant 3.200000e+01 : f32
    %202 = vector.broadcast %cst_78 : f32 to vector<8x1xf32>
    %203 = arith.divf %201, %202 : vector<8x1xf32>
    %204 = vector.broadcast %203 : vector<8x1xf32> to vector<8x32xf32>
    %205 = arith.subf %179, %204 : vector<8x32xf32>
    %206 = arith.mulf %205, %205 : vector<8x32xf32>
    %cst_79 = arith.constant dense<0.000000e+00> : vector<8xf32>
    %207 = vector.multi_reduction <add>, %206, %cst_79 [1] : vector<8x32xf32> to vector<8xf32>
    %208 = vector.shape_cast %207 : vector<8xf32> to vector<8x1xf32>
    %cst_80 = arith.constant 3.200000e+01 : f32
    %209 = vector.broadcast %cst_80 : f32 to vector<8x1xf32>
    %210 = arith.divf %208, %209 : vector<8x1xf32>
    %211 = vector.broadcast %203 : vector<8x1xf32> to vector<8x32xf32>
    %212 = arith.subf %179, %211 : vector<8x32xf32>
    %cst_81 = arith.constant 9.99999997E-7 : f32
    %213 = vector.broadcast %cst_81 : f32 to vector<8x1xf32>
    %214 = arith.addf %210, %213 : vector<8x1xf32>
    %215 = math.rsqrt %214 : vector<8x1xf32>
    %216 = vector.broadcast %215 : vector<8x1xf32> to vector<8x32xf32>
    %217 = arith.mulf %212, %216 : vector<8x32xf32>
    %218 = vector.broadcast %194 : vector<1x32xf32> to vector<8x32xf32>
    %219 = arith.mulf %217, %218 : vector<8x32xf32>
    %220 = vector.broadcast %195 : vector<1x32xf32> to vector<8x32xf32>
    %221 = arith.addf %219, %220 : vector<8x32xf32>
    %222 = arith.truncf %221 : vector<8x32xf32> to vector<8x32xbf16>
    %cst_82 = arith.constant dense<0.000000e+00> : vector<8x96xf32>
    %223 = tpu.matmul %222, %181, %cst_82 {dimension_numbers = #tpu.dot_dimension_numbers<[1], [0], [0], [1], [0, 0, 1, 1], [], []>} : vector<8x32xbf16>, vector<32x96xbf16>, vector<8x96xf32> -> vector<8x96xf32>
    %224 = vector.broadcast %183 : vector<1x96xf32> to vector<8x96xf32>
    %225 = arith.addf %223, %224 : vector<8x96xf32>
    %226 = vector.extract_strided_slice %225 {offsets = [0, 0], sizes = [8, 32], strides = [1, 1]} : vector<8x96xf32> to vector<8x32xf32>
    %cst_83 = arith.constant 0.353553385 : f32
    %227 = vector.broadcast %cst_83 : f32 to vector<8x32xf32>
    %228 = arith.mulf %226, %227 : vector<8x32xf32>
    %229 = vector.extract_strided_slice %225 {offsets = [0, 32], sizes = [8, 32], strides = [1, 1]} : vector<8x96xf32> to vector<8x32xf32>
    %230 = vector.extract_strided_slice %225 {offsets = [0, 64], sizes = [8, 32], strides = [1, 1]} : vector<8x96xf32> to vector<8x32xf32>
    %231 = vector.extract_strided_slice %228 {offsets = [0, 0], sizes = [8, 8], strides = [1, 1]} : vector<8x32xf32> to vector<8x8xf32>
    %232 = arith.truncf %231 : vector<8x8xf32> to vector<8x8xbf16>
    %233 = vector.extract_strided_slice %229 {offsets = [0, 0], sizes = [8, 8], strides = [1, 1]} : vector<8x32xf32> to vector<8x8xf32>
    %234 = arith.truncf %233 : vector<8x8xf32> to vector<8x8xbf16>
    %235 = vector.extract_strided_slice %230 {offsets = [0, 0], sizes = [8, 8], strides = [1, 1]} : vector<8x32xf32> to vector<8x8xf32>
    %236 = arith.truncf %235 : vector<8x8xf32> to vector<8x8xbf16>
    %237 = tpu.transpose %234, [1, 0] : vector<8x8xbf16> -> vector<8x8xbf16>
    %cst_84 = arith.constant dense<0.000000e+00> : vector<8x8xf32>
    %238 = tpu.matmul %232, %237, %cst_84 {dimension_numbers = #tpu.dot_dimension_numbers<[1], [0], [0], [1], [0, 0, 1, 1], [], []>} : vector<8x8xbf16>, vector<8x8xbf16>, vector<8x8xf32> -> vector<8x8xf32>
    %239 = arith.addf %238, %5 : vector<8x8xf32>
    %cst_85 = arith.constant dense<0xFF800000> : vector<8xf32>
    %240 = vector.multi_reduction <maximumf>, %239, %cst_85 [1] : vector<8x8xf32> to vector<8xf32>
    %241 = vector.shape_cast %240 : vector<8xf32> to vector<8x1xf32>
    %242 = vector.broadcast %241 : vector<8x1xf32> to vector<8x8xf32>
    %243 = arith.subf %239, %242 : vector<8x8xf32>
    %244 = math.exp %243 : vector<8x8xf32>
    %cst_86 = arith.constant dense<0.000000e+00> : vector<8xf32>
    %245 = vector.multi_reduction <add>, %244, %cst_86 [1] : vector<8x8xf32> to vector<8xf32>
    %246 = vector.shape_cast %245 : vector<8xf32> to vector<8x1xf32>
    %247 = tpu.reciprocal %246 {approx = true} : vector<8x1xf32> -> vector<8x1xf32>
    %248 = vector.broadcast %247 : vector<8x1xf32> to vector<8x8xf32>
    %249 = arith.mulf %244, %248 : vector<8x8xf32>
    %250 = arith.truncf %249 : vector<8x8xf32> to vector<8x8xbf16>
    %cst_87 = arith.constant dense<0.000000e+00> : vector<8x8xf32>
    %251 = tpu.matmul %250, %236, %cst_87 {dimension_numbers = #tpu.dot_dimension_numbers<[1], [0], [0], [1], [0, 0, 1, 1], [], []>} : vector<8x8xbf16>, vector<8x8xbf16>, vector<8x8xf32> -> vector<8x8xf32>
    %252 = vector.extract_strided_slice %228 {offsets = [0, 8], sizes = [8, 8], strides = [1, 1]} : vector<8x32xf32> to vector<8x8xf32>
    %253 = arith.truncf %252 : vector<8x8xf32> to vector<8x8xbf16>
    %254 = vector.extract_strided_slice %229 {offsets = [0, 8], sizes = [8, 8], strides = [1, 1]} : vector<8x32xf32> to vector<8x8xf32>
    %255 = arith.truncf %254 : vector<8x8xf32> to vector<8x8xbf16>
    %256 = vector.extract_strided_slice %230 {offsets = [0, 8], sizes = [8, 8], strides = [1, 1]} : vector<8x32xf32> to vector<8x8xf32>
    %257 = arith.truncf %256 : vector<8x8xf32> to vector<8x8xbf16>
    %258 = tpu.transpose %255, [1, 0] : vector<8x8xbf16> -> vector<8x8xbf16>
    %cst_88 = arith.constant dense<0.000000e+00> : vector<8x8xf32>
    %259 = tpu.matmul %253, %258, %cst_88 {dimension_numbers = #tpu.dot_dimension_numbers<[1], [0], [0], [1], [0, 0, 1, 1], [], []>} : vector<8x8xbf16>, vector<8x8xbf16>, vector<8x8xf32> -> vector<8x8xf32>
    %260 = arith.addf %259, %5 : vector<8x8xf32>
    %cst_89 = arith.constant dense<0xFF800000> : vector<8xf32>
    %261 = vector.multi_reduction <maximumf>, %260, %cst_89 [1] : vector<8x8xf32> to vector<8xf32>
    %262 = vector.shape_cast %261 : vector<8xf32> to vector<8x1xf32>
    %263 = vector.broadcast %262 : vector<8x1xf32> to vector<8x8xf32>
    %264 = arith.subf %260, %263 : vector<8x8xf32>
    %265 = math.exp %264 : vector<8x8xf32>
    %cst_90 = arith.constant dense<0.000000e+00> : vector<8xf32>
    %266 = vector.multi_reduction <add>, %265, %cst_90 [1] : vector<8x8xf32> to vector<8xf32>
    %267 = vector.shape_cast %266 : vector<8xf32> to vector<8x1xf32>
    %268 = tpu.reciprocal %267 {approx = true} : vector<8x1xf32> -> vector<8x1xf32>
    %269 = vector.broadcast %268 : vector<8x1xf32> to vector<8x8xf32>
    %270 = arith.mulf %265, %269 : vector<8x8xf32>
    %271 = arith.truncf %270 : vector<8x8xf32> to vector<8x8xbf16>
    %cst_91 = arith.constant dense<0.000000e+00> : vector<8x8xf32>
    %272 = tpu.matmul %271, %257, %cst_91 {dimension_numbers = #tpu.dot_dimension_numbers<[1], [0], [0], [1], [0, 0, 1, 1], [], []>} : vector<8x8xbf16>, vector<8x8xbf16>, vector<8x8xf32> -> vector<8x8xf32>
    %273 = vector.extract_strided_slice %228 {offsets = [0, 16], sizes = [8, 8], strides = [1, 1]} : vector<8x32xf32> to vector<8x8xf32>
    %274 = arith.truncf %273 : vector<8x8xf32> to vector<8x8xbf16>
    %275 = vector.extract_strided_slice %229 {offsets = [0, 16], sizes = [8, 8], strides = [1, 1]} : vector<8x32xf32> to vector<8x8xf32>
    %276 = arith.truncf %275 : vector<8x8xf32> to vector<8x8xbf16>
    %277 = vector.extract_strided_slice %230 {offsets = [0, 16], sizes = [8, 8], strides = [1, 1]} : vector<8x32xf32> to vector<8x8xf32>
    %278 = arith.truncf %277 : vector<8x8xf32> to vector<8x8xbf16>
    %279 = tpu.transpose %276, [1, 0] : vector<8x8xbf16> -> vector<8x8xbf16>
    %cst_92 = arith.constant dense<0.000000e+00> : vector<8x8xf32>
    %280 = tpu.matmul %274, %279, %cst_92 {dimension_numbers = #tpu.dot_dimension_numbers<[1], [0], [0], [1], [0, 0, 1, 1], [], []>} : vector<8x8xbf16>, vector<8x8xbf16>, vector<8x8xf32> -> vector<8x8xf32>
    %281 = arith.addf %280, %5 : vector<8x8xf32>
    %cst_93 = arith.constant dense<0xFF800000> : vector<8xf32>
    %282 = vector.multi_reduction <maximumf>, %281, %cst_93 [1] : vector<8x8xf32> to vector<8xf32>
    %283 = vector.shape_cast %282 : vector<8xf32> to vector<8x1xf32>
    %284 = vector.broadcast %283 : vector<8x1xf32> to vector<8x8xf32>
    %285 = arith.subf %281, %284 : vector<8x8xf32>
    %286 = math.exp %285 : vector<8x8xf32>
    %cst_94 = arith.constant dense<0.000000e+00> : vector<8xf32>
    %287 = vector.multi_reduction <add>, %286, %cst_94 [1] : vector<8x8xf32> to vector<8xf32>
    %288 = vector.shape_cast %287 : vector<8xf32> to vector<8x1xf32>
    %289 = tpu.reciprocal %288 {approx = true} : vector<8x1xf32> -> vector<8x1xf32>
    %290 = vector.broadcast %289 : vector<8x1xf32> to vector<8x8xf32>
    %291 = arith.mulf %286, %290 : vector<8x8xf32>
    %292 = arith.truncf %291 : vector<8x8xf32> to vector<8x8xbf16>
    %cst_95 = arith.constant dense<0.000000e+00> : vector<8x8xf32>
    %293 = tpu.matmul %292, %278, %cst_95 {dimension_numbers = #tpu.dot_dimension_numbers<[1], [0], [0], [1], [0, 0, 1, 1], [], []>} : vector<8x8xbf16>, vector<8x8xbf16>, vector<8x8xf32> -> vector<8x8xf32>
    %294 = vector.extract_strided_slice %228 {offsets = [0, 24], sizes = [8, 8], strides = [1, 1]} : vector<8x32xf32> to vector<8x8xf32>
    %295 = arith.truncf %294 : vector<8x8xf32> to vector<8x8xbf16>
    %296 = vector.extract_strided_slice %229 {offsets = [0, 24], sizes = [8, 8], strides = [1, 1]} : vector<8x32xf32> to vector<8x8xf32>
    %297 = arith.truncf %296 : vector<8x8xf32> to vector<8x8xbf16>
    %298 = vector.extract_strided_slice %230 {offsets = [0, 24], sizes = [8, 8], strides = [1, 1]} : vector<8x32xf32> to vector<8x8xf32>
    %299 = arith.truncf %298 : vector<8x8xf32> to vector<8x8xbf16>
    %300 = tpu.transpose %297, [1, 0] : vector<8x8xbf16> -> vector<8x8xbf16>
    %cst_96 = arith.constant dense<0.000000e+00> : vector<8x8xf32>
    %301 = tpu.matmul %295, %300, %cst_96 {dimension_numbers = #tpu.dot_dimension_numbers<[1], [0], [0], [1], [0, 0, 1, 1], [], []>} : vector<8x8xbf16>, vector<8x8xbf16>, vector<8x8xf32> -> vector<8x8xf32>
    %302 = arith.addf %301, %5 : vector<8x8xf32>
    %cst_97 = arith.constant dense<0xFF800000> : vector<8xf32>
    %303 = vector.multi_reduction <maximumf>, %302, %cst_97 [1] : vector<8x8xf32> to vector<8xf32>
    %304 = vector.shape_cast %303 : vector<8xf32> to vector<8x1xf32>
    %305 = vector.broadcast %304 : vector<8x1xf32> to vector<8x8xf32>
    %306 = arith.subf %302, %305 : vector<8x8xf32>
    %307 = math.exp %306 : vector<8x8xf32>
    %cst_98 = arith.constant dense<0.000000e+00> : vector<8xf32>
    %308 = vector.multi_reduction <add>, %307, %cst_98 [1] : vector<8x8xf32> to vector<8xf32>
    %309 = vector.shape_cast %308 : vector<8xf32> to vector<8x1xf32>
    %310 = tpu.reciprocal %309 {approx = true} : vector<8x1xf32> -> vector<8x1xf32>
    %311 = vector.broadcast %310 : vector<8x1xf32> to vector<8x8xf32>
    %312 = arith.mulf %307, %311 : vector<8x8xf32>
    %313 = arith.truncf %312 : vector<8x8xf32> to vector<8x8xbf16>
    %cst_99 = arith.constant dense<0.000000e+00> : vector<8x8xf32>
    %314 = tpu.matmul %313, %299, %cst_99 {dimension_numbers = #tpu.dot_dimension_numbers<[1], [0], [0], [1], [0, 0, 1, 1], [], []>} : vector<8x8xbf16>, vector<8x8xbf16>, vector<8x8xf32> -> vector<8x8xf32>
    %315 = tpu.concatenate %251, %272, %293, %314 in 1 : vector<8x8xf32>, vector<8x8xf32>, vector<8x8xf32>, vector<8x8xf32> -> vector<8x32xf32>
    %316 = arith.truncf %315 : vector<8x32xf32> to vector<8x32xbf16>
    %cst_100 = arith.constant dense<0.000000e+00> : vector<8x32xf32>
    %317 = tpu.matmul %316, %185, %cst_100 {dimension_numbers = #tpu.dot_dimension_numbers<[1], [0], [0], [1], [0, 0, 1, 1], [], []>} : vector<8x32xbf16>, vector<32x32xbf16>, vector<8x32xf32> -> vector<8x32xf32>
    %318 = vector.broadcast %198 : vector<1x32xf32> to vector<8x32xf32>
    %319 = arith.addf %317, %318 : vector<8x32xf32>
    %320 = arith.addf %179, %319 : vector<8x32xf32>
    %cst_101 = arith.constant dense<0.000000e+00> : vector<8xf32>
    %321 = vector.multi_reduction <add>, %320, %cst_101 [1] : vector<8x32xf32> to vector<8xf32>
    %322 = vector.shape_cast %321 : vector<8xf32> to vector<8x1xf32>
    %cst_102 = arith.constant 3.200000e+01 : f32
    %323 = vector.broadcast %cst_102 : f32 to vector<8x1xf32>
    %324 = arith.divf %322, %323 : vector<8x1xf32>
    %325 = vector.broadcast %324 : vector<8x1xf32> to vector<8x32xf32>
    %326 = arith.subf %320, %325 : vector<8x32xf32>
    %327 = arith.mulf %326, %326 : vector<8x32xf32>
    %cst_103 = arith.constant dense<0.000000e+00> : vector<8xf32>
    %328 = vector.multi_reduction <add>, %327, %cst_103 [1] : vector<8x32xf32> to vector<8xf32>
    %329 = vector.shape_cast %328 : vector<8xf32> to vector<8x1xf32>
    %cst_104 = arith.constant 3.200000e+01 : f32
    %330 = vector.broadcast %cst_104 : f32 to vector<8x1xf32>
    %331 = arith.divf %329, %330 : vector<8x1xf32>
    %332 = vector.broadcast %324 : vector<8x1xf32> to vector<8x32xf32>
    %333 = arith.subf %320, %332 : vector<8x32xf32>
    %cst_105 = arith.constant 9.99999997E-7 : f32
    %334 = vector.broadcast %cst_105 : f32 to vector<8x1xf32>
    %335 = arith.addf %331, %334 : vector<8x1xf32>
    %336 = math.rsqrt %335 : vector<8x1xf32>
    %337 = vector.broadcast %336 : vector<8x1xf32> to vector<8x32xf32>
    %338 = arith.mulf %333, %337 : vector<8x32xf32>
    %339 = vector.broadcast %196 : vector<1x32xf32> to vector<8x32xf32>
    %340 = arith.mulf %338, %339 : vector<8x32xf32>
    %341 = vector.broadcast %197 : vector<1x32xf32> to vector<8x32xf32>
    %342 = arith.addf %340, %341 : vector<8x32xf32>
    %343 = arith.truncf %342 : vector<8x32xf32> to vector<8x32xbf16>
    %cst_106 = arith.constant dense<0.000000e+00> : vector<8x64xf32>
    %344 = tpu.matmul %343, %189, %cst_106 {dimension_numbers = #tpu.dot_dimension_numbers<[1], [0], [0], [1], [0, 0, 1, 1], [], []>} : vector<8x32xbf16>, vector<32x64xbf16>, vector<8x64xf32> -> vector<8x64xf32>
    %345 = vector.broadcast %191 : vector<1x64xf32> to vector<8x64xf32>
    %346 = arith.addf %344, %345 : vector<8x64xf32>
    %cst_107 = arith.constant 0.000000e+00 : f32
    %347 = vector.broadcast %cst_107 : f32 to vector<8x64xf32>
    %348 = arith.maximumf %346, %347 : vector<8x64xf32>
    %349 = arith.truncf %348 : vector<8x64xf32> to vector<8x64xbf16>
    %cst_108 = arith.constant dense<0.000000e+00> : vector<8x32xf32>
    %350 = tpu.matmul %349, %193, %cst_108 {dimension_numbers = #tpu.dot_dimension_numbers<[1], [0], [0], [1], [0, 0, 1, 1], [], []>} : vector<8x64xbf16>, vector<64x32xbf16>, vector<8x32xf32> -> vector<8x32xf32>
    %351 = vector.broadcast %199 : vector<1x32xf32> to vector<8x32xf32>
    %352 = arith.addf %350, %351 : vector<8x32xf32>
    %353 = arith.addf %320, %352 : vector<8x32xf32>
    %c0_109 = arith.constant 0 : index
    %c0_110 = arith.constant 0 : index
    %354 = vector.load %arg10[%c0_109, %c0_110] : memref<2x32xf32, #tpu.memory_space<vmem>>, vector<2x32xf32>
    %355 = vector.extract_strided_slice %354 {offsets = [0, 0], sizes = [1, 32], strides = [1, 1]} : vector<2x32xf32> to vector<1x32xf32>
    %356 = vector.extract_strided_slice %354 {offsets = [1, 0], sizes = [1, 32], strides = [1, 1]} : vector<2x32xf32> to vector<1x32xf32>
    %cst_111 = arith.constant dense<0.000000e+00> : vector<8xf32>
    %357 = vector.multi_reduction <add>, %353, %cst_111 [1] : vector<8x32xf32> to vector<8xf32>
    %358 = vector.shape_cast %357 : vector<8xf32> to vector<8x1xf32>
    %cst_112 = arith.constant 3.200000e+01 : f32
    %359 = vector.broadcast %cst_112 : f32 to vector<8x1xf32>
    %360 = arith.divf %358, %359 : vector<8x1xf32>
    %361 = vector.broadcast %360 : vector<8x1xf32> to vector<8x32xf32>
    %362 = arith.subf %353, %361 : vector<8x32xf32>
    %363 = arith.mulf %362, %362 : vector<8x32xf32>
    %cst_113 = arith.constant dense<0.000000e+00> : vector<8xf32>
    %364 = vector.multi_reduction <add>, %363, %cst_113 [1] : vector<8x32xf32> to vector<8xf32>
    %365 = vector.shape_cast %364 : vector<8xf32> to vector<8x1xf32>
    %cst_114 = arith.constant 3.200000e+01 : f32
    %366 = vector.broadcast %cst_114 : f32 to vector<8x1xf32>
    %367 = arith.divf %365, %366 : vector<8x1xf32>
    %368 = vector.broadcast %360 : vector<8x1xf32> to vector<8x32xf32>
    %369 = arith.subf %353, %368 : vector<8x32xf32>
    %cst_115 = arith.constant 9.99999997E-7 : f32
    %370 = vector.broadcast %cst_115 : f32 to vector<8x1xf32>
    %371 = arith.addf %367, %370 : vector<8x1xf32>
    %372 = math.rsqrt %371 : vector<8x1xf32>
    %373 = vector.broadcast %372 : vector<8x1xf32> to vector<8x32xf32>
    %374 = arith.mulf %369, %373 : vector<8x32xf32>
    %375 = vector.broadcast %355 : vector<1x32xf32> to vector<8x32xf32>
    %376 = arith.mulf %374, %375 : vector<8x32xf32>
    %377 = vector.broadcast %356 : vector<1x32xf32> to vector<8x32xf32>
    %378 = arith.addf %376, %377 : vector<8x32xf32>
    %cst_116 = arith.constant dense<0.000000e+00> : vector<32xf32>
    %379 = vector.multi_reduction <add>, %378, %cst_116 [0] : vector<8x32xf32> to vector<32xf32>
    %380 = vector.shape_cast %379 : vector<32xf32> to vector<1x32xf32>
    %cst_117 = arith.constant 8.000000e+00 : f32
    %381 = vector.broadcast %cst_117 : f32 to vector<1x32xf32>
    %382 = arith.divf %380, %381 : vector<1x32xf32>
    %383 = arith.truncf %382 : vector<1x32xf32> to vector<1x32xbf16>
    %c0_118 = arith.constant 0 : index
    %c0_119 = arith.constant 0 : index
    %384 = vector.load %arg11[%c0_118, %c0_119] : memref<32x128xbf16, #tpu.memory_space<vmem>>, vector<32x128xbf16>
    %cst_120 = arith.constant dense<0.000000e+00> : vector<1x128xf32>
    %385 = tpu.matmul %383, %384, %cst_120 {dimension_numbers = #tpu.dot_dimension_numbers<[1], [0], [0], [1], [0, 0, 1, 1], [], []>} : vector<1x32xbf16>, vector<32x128xbf16>, vector<1x128xf32> -> vector<1x128xf32>
    %c0_121 = arith.constant 0 : index
    %c0_122 = arith.constant 0 : index
    %386 = vector.load %arg12[%c0_121, %c0_122] : memref<1x128xf32, #tpu.memory_space<vmem>>, vector<1x128xf32>
    %387 = arith.addf %385, %386 : vector<1x128xf32>
    %cst_123 = arith.constant dense<0xFF800000> : vector<1xf32>
    %388 = vector.multi_reduction <maximumf>, %387, %cst_123 [1] : vector<1x128xf32> to vector<1xf32>
    %389 = vector.shape_cast %388 : vector<1xf32> to vector<1x1xf32>
    %390 = vector.broadcast %389 : vector<1x1xf32> to vector<1x128xf32>
    %391 = arith.subf %387, %390 : vector<1x128xf32>
    %392 = math.exp %391 : vector<1x128xf32>
    %cst_124 = arith.constant dense<0.000000e+00> : vector<1xf32>
    %393 = vector.multi_reduction <add>, %392, %cst_124 [1] : vector<1x128xf32> to vector<1xf32>
    %394 = vector.shape_cast %393 : vector<1xf32> to vector<1x1xf32>
    %395 = math.log %394 : vector<1x1xf32>
    %396 = arith.addf %395, %389 : vector<1x1xf32>
    %397 = vector.broadcast %396 : vector<1x1xf32> to vector<1x128xf32>
    %398 = arith.subf %387, %397 : vector<1x128xf32>
    %c0_125 = arith.constant 0 : index
    %c0_126 = arith.constant 0 : index
    %c0_127 = arith.constant 0 : index
    %399 = vector.load %arg13[%c0_125, %c0_126, %c0_127] : memref<1x1x128xf32, #tpu.memory_space<vmem>>, vector<1x1x128xf32>
    %400 = vector.shape_cast %399 : vector<1x1x128xf32> to vector<1x128xf32>
    %401 = vector.shape_cast %398 : vector<1x128xf32> to vector<1x1x128xf32>
    tpu.vector_store %arg13[%c0_125, %c0_126, %c0_127], %401 {strides = array<i32>} : memref<1x1x128xf32, #tpu.memory_space<vmem>>, vector<1x1x128xf32>,
    return
  }
  func.func @transform_0(%arg0: i32) -> (i32, i32, i32) {
    %c0_i32 = arith.constant 0 : i32
    %c0_i32_0 = arith.constant 0 : i32
    %c0_i32_1 = arith.constant 0 : i32
    return %arg0, %c0_i32, %c0_i32_0 : i32, i32, i32
  }
  func.func @transform_1(%arg0: i32) -> (i32, i32, i32) {
    %c0_i32 = arith.constant 0 : i32
    %c0_i32_0 = arith.constant 0 : i32
    %c0_i32_1 = arith.constant 0 : i32
    return %arg0, %c0_i32, %c0_i32_0 : i32, i32, i32
  }
  func.func @transform_2(%arg0: i32) -> (i32, i32, i32) {
    %c0_i32 = arith.constant 0 : i32
    %c0_i32_0 = arith.constant 0 : i32
    %c0_i32_1 = arith.constant 0 : i32
    %c0_i32_2 = arith.constant 0 : i32
    return %c0_i32, %c0_i32_0, %c0_i32_1 : i32, i32, i32
  }
  func.func @transform_3(%arg0: i32) -> (i32, i32, i32) {
    %c0_i32 = arith.constant 0 : i32
    %c0_i32_0 = arith.constant 0 : i32
    %c0_i32_1 = arith.constant 0 : i32
    %c0_i32_2 = arith.constant 0 : i32
    return %c0_i32, %c0_i32_0, %c0_i32_1 : i32, i32, i32
  }
  func.func @transform_4(%arg0: i32) -> (i32, i32, i32) {
    %c0_i32 = arith.constant 0 : i32
    %c0_i32_0 = arith.constant 0 : i32
    %c0_i32_1 = arith.constant 0 : i32
    %c0_i32_2 = arith.constant 0 : i32
    return %c0_i32, %c0_i32_0, %c0_i32_1 : i32, i32, i32
  }
  func.func @transform_5(%arg0: i32) -> (i32, i32, i32) {
    %c0_i32 = arith.constant 0 : i32
    %c0_i32_0 = arith.constant 0 : i32
    %c0_i32_1 = arith.constant 0 : i32
    %c0_i32_2 = arith.constant 0 : i32
    return %c0_i32, %c0_i32_0, %c0_i32_1 : i32, i32, i32
  }
  func.func @transform_6(%arg0: i32) -> (i32, i32, i32) {
    %c0_i32 = arith.constant 0 : i32
    %c0_i32_0 = arith.constant 0 : i32
    %c0_i32_1 = arith.constant 0 : i32
    %c0_i32_2 = arith.constant 0 : i32
    return %c0_i32, %c0_i32_0, %c0_i32_1 : i32, i32, i32
  }
  func.func @transform_7(%arg0: i32) -> (i32, i32, i32) {
    %c0_i32 = arith.constant 0 : i32
    %c0_i32_0 = arith.constant 0 : i32
    %c0_i32_1 = arith.constant 0 : i32
    %c0_i32_2 = arith.constant 0 : i32
    return %c0_i32, %c0_i32_0, %c0_i32_1 : i32, i32, i32
  }
  func.func @transform_8(%arg0: i32) -> (i32, i32, i32) {
    %c0_i32 = arith.constant 0 : i32
    %c0_i32_0 = arith.constant 0 : i32
    %c0_i32_1 = arith.constant 0 : i32
    %c0_i32_2 = arith.constant 0 : i32
    return %c0_i32, %c0_i32_0, %c0_i32_1 : i32, i32, i32
  }
  func.func @transform_9(%arg0: i32) -> (i32, i32) {
    %c0_i32 = arith.constant 0 : i32
    %c0_i32_0 = arith.constant 0 : i32
    %c0_i32_1 = arith.constant 0 : i32
    return %c0_i32, %c0_i32_0 : i32, i32
  }
  func.func @transform_10(%arg0: i32) -> (i32, i32) {
    %c0_i32 = arith.constant 0 : i32
    %c0_i32_0 = arith.constant 0 : i32
    %c0_i32_1 = arith.constant 0 : i32
    return %c0_i32, %c0_i32_0 : i32, i32
  }
  func.func @transform_11(%arg0: i32) -> (i32, i32) {
    %c0_i32 = arith.constant 0 : i32
    %c0_i32_0 = arith.constant 0 : i32
    %c0_i32_1 = arith.constant 0 : i32
    return %c0_i32, %c0_i32_0 : i32, i32
  }
  func.func @transform_12(%arg0: i32) -> (i32, i32, i32) {
    %c0_i32 = arith.constant 0 : i32
    %c0_i32_0 = arith.constant 0 : i32
    %c0_i32_1 = arith.constant 0 : i32
    return %arg0, %c0_i32, %c0_i32_0 : i32, i32, i32
  }
}

</mosaic_0001>

<bundles_post_ra>
// kernel: transformer_forward.1
= control target key start
LH: loop header
LB: loop body
LE: loop exit
PB: predicated region body
PF: predicated region fallthrough
CT: control target
= control target key end

     0   :  { %s3256_s0 = inlined_call_operand.vmem [shape: f32[2,8,32], index: 0, kind: input, shape index: {}]   ;;  %s3257_s1 = inlined_call_operand.vmem [shape: f32[2,1,8], index: 1, kind: input, shape index: {}]   ;;  %s3258_s2 = inlined_call_operand.vmem [shape: bf16[2,32,96], index: 2, kind: input, shape index: {}]   ;;  %s3259_s3 = inlined_call_operand.vmem [shape: f32[2,1,96], index: 3, kind: input, shape index: {}]   ;;  %s3260_s4 = inlined_call_operand.vmem [shape: bf16[2,32,32], index: 4, kind: input, shape index: {}]   ;;  %s3261_s5 = inlined_call_operand.vmem [shape: f32[2,6,32], index: 5, kind: input, shape index: {}]   ;;  %s3262_s6 = inlined_call_operand.vmem [shape: bf16[2,32,64], index: 6, kind: input, shape index: {}]   ;;  %s3263_s7 = inlined_call_operand.vmem [shape: f32[2,1,64], index: 7, kind: input, shape index: {}]   ;;  %s3264_s8 = inlined_call_operand.vmem [shape: bf16[2,64,32], index: 8, kind: input, shape index: {}]   ;;  %s3265_s9 = inlined_call_operand.vmem [shape: f32[2,32], index: 9, kind: input, shape index: {}]   ;;  %s3266_s10 = inlined_call_operand.vmem [shape: bf16[32,128], index: 10, kind: input, shape index: {}]   ;;  %s3267_s11 = inlined_call_operand.vmem [shape: f32[1,128], index: 11, kind: input, shape index: {}]   ;;  %s3268_s12 = inlined_call_operand.hbm [shape: f32[2,1,128], index: 12, kind: output, shape index: {}]  }
   0x1   :  { %3282 = sst [smem:[#allocation5_spill]] %s3256_s0 }
   0x2   :  { %3283 = sst [smem:[#allocation6_spill]] %s3257_s1 }
   0x3   :  { %3284 = sst [smem:[#allocation7_spill]] %s3258_s2 }
   0x4   :  { %17 = vsyncpa [#allocation3], 0 }
   0x5   :  { %19 = vsyncpa [#allocation3 + $0x1], 0  ;;  %s2792_s21 = smov 0   ;;  %s2794_s22 = smov 0  }
   0x6   :  { %s2796_s23 = smov 0   ;;  %s2798_s24 = smov 0  }
   0x7 LB: > { %s2813_s25 = sadd.s32 4294967295, %s2708_s24   ;;  %s2203_s26 = sadd.s32 4294967294, %s2708_s24   ;;  %s2708_s24 = sphi %s2798_s24, %s3306_s24   ;;  %s2704_s23 = sphi %s2796_s23, %s3305_s23   ;;  %s2700_s22 = sphi %s2794_s22, %s3304_s22   ;;  %s2696_s21 = sphi %s2792_s21, %s3303_s21  }
   0x8   : > { %s2817_s27 = sadd.s32 1, %s2708_s24   ;;  %s294_s28 = sadd.s32 1, %s2704_s23 }
   0x9   : > { %s291_s29 = ssub.s32 %s2708_s24, %s2817_s27  ;;  %p304_p0 = scmp.ne.s32.totalorder %s2704_s23, %s2700_s22 }
   0xa   : > { %p292_p1 = scmp.eq.s32.totalorder %s291_s29, 0  ;;  %p305_p2 = scmp.eq.s32.totalorder %s2813_s25, 1 }
   0xb   : > { %p310_p3 = scmp.ne.s32.totalorder %s2700_s22, %s2696_s21  ;;  %p311_p4 = scmp.eq.s32.totalorder %s2203_s26, 1 }
   0xc   : > { %s2828_s30 = scalar_select %p292_p1, %s2704_s23, %s294_s28  }
   0xd   : > { %p2830_p5 = por %p305_p2, %p304_p0  ;;  %p2834_p6 = por %p311_p4, %p310_p3 }
   0xe   : > { %p2206_p7 = scmp.ge.s32.totalorder %s2708_s24, 1  ;;  %p372_p8 = scmp.lt.s32.totalorder %s2708_s24, 3 }
  0x10   : > { %p373_p9 = pnand %p2206_p7, %p372_p8 }
  0x11   : > { %p415_p10 = scmp.lt.s32.totalorder (!%p373_p9), %s2813_s25, 1  ;;  %s3287_s0 = sld [smem:[#allocation5_spill]] (!%p373_p9) }
  0x12   : > { %376 = sbr.rel (%p373_p9) target bundleno = 5705 (0x1649), region = 68  ;;  %s3288_s2 = sld [smem:[#allocation7_spill]] (!%p373_p9) }
  0x13   : > { %s3281_s20 = smov (!%p373_p9), 96   ;;  %s3276_s26 = smov (!%p373_p9), 120  }
  0x14   : > { %s2714_s28 = smov (!%p373_p9), 88   ;;  %s3280_s29 = smov (!%p373_p9), 80  }
  0x15   : > { %s3275_s17 = smov (!%p373_p9), 72   ;;  %s3269_s18 = smov (!%p373_p9), 104  }
  0x16   : > { %s3289_s1 = sld [smem:[#allocation6_spill]] (!%p373_p9) }
  0x17   : > { %s2842_s15 = scalar_select %p415_p10, %s2813_s25, 1  ;;  %vm454_vm0 = vcmask 261120   ;;  %v2710_v8 = vmov 0.0   ;;  %vm2711_vm1 = vmmov 0   ;;  %v469_v13 = vlaneseq  ;;  %v2876_v16 = vld [vmem:[%s3261_s5] sm:$0x3f] }
  0x18   : > { %v2580_v7 = vld [vmem:[%s3288_s2 + $0x8] sm:$0xff]   ;;  %2349 = vmatprep.subr.bf16.mxu0 %v2710_v8  ;;  %2353 = vmatprep.mubr.msk.bf16.mxu0 %vm2711_vm1, %v2710_v8  ;;  %v2581_v9 = vld [vmem:[%s3288_s2] sm:$0xff]   ;;  %vm547_vm2 = vcmask 64512   ;;  %vm611_vm3 = vcmask 1043456   ;;  %vm999_vm4 = vcmask 130048   ;;  %vm1001_vm5 = vcmask 195584  }
  0x19   : > { %s2207_s16 = sshll.u32 %s2842_s15, 3  ;;  %2350 = vmatpush3.bf16.msra.mxu0 %v2580_v7  ;;  %2357 = vmatprep.subr.bf16.mxu1 %v2710_v8  ;;  %v2868_v14 = vshrl.u32 %v469_v13, 7  ;;  %v2209_v25 = vld [vmem:[%s3259_s3] ss:$0 sm:$0xff]  ;;  %vm1179_vm6 = vcmask 523264   ;;  %vm2111_vm7 = vcmask 1040384  }
  0x1a   : > { %s418_s19 = scalar_lea.vmem %s3287_s0, %s2207_s16  ;;  %2351 = vmatprep.subr.bf16.mxu0 %v2710_v8  ;;  %2359 = vmatprep.mubr.msk.bf16.mxu1 %vm2711_vm1, %v2710_v8  ;;  %s3270_s16 = smov 112  }
  0x1b   : > { %v2848_v0 = vld [vmem:[%s418_s19] sm:$0xff]  ;;  %v2871_v15 = vsub.s32 0, %v2868_v14  ;;  %v2879_v17 = vsub.s32 1, %v2868_v14  ;;  %s3271_s19 = smov 40   ;;  %s2726_s0 = smov [#allocation2]  }
  0x1c   : > { %v455_v1 = vsel %vm454_vm0, %v2848_v0, 0.0 }
  0x1d   : > { %456 = vadd.xlane.f32.xlu0 %v455_v1  ;;  %2352 = vmatpush3.bf16.msra.mxu0 %v2581_v9  ;;  %v472_v18 = vrot.slane %v2876_v16, %v2871_v15  ;;  %v477_v21 = vrot.slane %v2876_v16, %v2879_v17 }
  0x1e   : > { %2363 = vmatprep.subr.bf16.mxu0 %v2710_v8 }
  0xa6   : > { %v457_v2 = vpop.xlane.xlu0 %456 }
  0xa7   : > { %v459_v3 = vmul.f32 0.03125, %v457_v2 }
  0xa9   : > { %v460_v4 = vsub.f32 %v2848_v0, %v459_v3 }
  0xab   : > { %v461_v5 = vmul.f32 %v460_v4, %v460_v4 }
  0xad   : > { %v462_v6 = vsel %vm454_vm0, %v461_v5, 0.0 }
  0xae   : > { %463 = vadd.xlane.f32.xlu0 %v462_v6 }
 0x137   : > { %v464_v10 = vpop.xlane.xlu0 %463 }
 0x138   : > { %v465_v11 = vmul.f32 0.03125, %v464_v10 }
 0x13a   : > { %v466_v12 = vadd.f32 1e-06, %v465_v11 }
 0x13c   : > { %2602 = vrsqrt.f32 %v466_v12 }
 0x149   : > { %v2603_v19 = vpop.eup %2602 }
 0x14a   : > { %v468_v20 = vmul.f32 %v2603_v19, %v460_v4 }
 0x14c   : > { %v473_v22 = vmul.f32 %v472_v18, %v468_v20 }
 0x14e   : > { %v478_v23 = vadd.f32 %v477_v21, %v473_v22 }
 0x150   : > { %v479_v24 = vpack.c.bf16 %v478_v23, %v478_v23 }
 0x152   : > { %2354 = vmatmul.mubr.msk.bf16.vlgmr.msra.gmra.mxu0 %vm454_vm0, %v479_v24 }
 0x153   : > { %2365 = vmatprep.mubr.msk.bf16.mxu0 %vm2711_vm1, %v2710_v8 }
 0x212   : > { %v535_v26 = vpop.f32.mrf.mxu0 }
 0x213   : > { %v536_v27 = vadd.f32 %v2209_v25, %v535_v26 }
 0x214   : > { %v2355_v28 = vpop.f32.mrf.mxu0 }
 0x215   : > { %v541_v29 = vmul.f32 0.35355338, %v536_v27  ;;  %v2891_v30 = vpack.c.bf16 %v536_v27, %v536_v27 }
 0x216   : > { %v538_v31 = vpop.f32.mrf.mxu0 }
 0x217   : > { %v542_v32 = vpack.c.bf16 %v541_v29, %v541_v29  ;;  %545 = vrot.lane.b32.xlu1 %v2891_v30, %s3281_s20  ;;  %s3292_s20 = smov 120  }
 0x218   : > { %v2356_v33 = vpop.f32.mrf.mxu0 }
 0x219   : > { %656 = vrot.lane.b32.xlu0 %v542_v32, %s3276_s26  ;;  %s3278_s26 = smov 16  }
 0x21b   : > { %658 = vrot.lane.b32.xlu1 %v2891_v30, %s2714_s28 }
 0x21f   : > { %768 = vrot.lane.b32.xlu1 %v2891_v30, %s3280_s29  ;;  %s3294_s29 = smov 112  }
 0x223   : > { %766 = vrot.lane.b32.xlu1 %v542_v32, %s3270_s16  ;;  %s421_s16 = scalar_lea.vmem %s3289_s1, %s2842_s15  ;;  %s3274_s15 = smov 64  }
 0x224   : > { %v2928_v45 = vld [vmem:[%s421_s16] ss:$0 sm:$0xff]  ;;  %s3273_s16 = smov 56   ;;  %s2652_s1 = sshll.u32 %s2726_s0, 4  ;;  %s2653_s1 = int_to_ptr.vmem [resolvable:$false] %s2652_s1 }
 0x227   : > { %878 = vrot.lane.b32.xlu1 %v2891_v30, %s3275_s17  ;;  %s3298_s17 = smov 48  }
 0x22b   : > { %876 = vrot.lane.b32.xlu1 %v542_v32, %s3269_s18  ;;  %s3272_s18 = smov 48  }
 0x289   : > { %v546_v34 = vpop.permute.xlu1 %545 }
 0x28a   : > { %v552_v35 = vsel %vm547_vm2, %v546_v34, 0 }
 0x28b   : > { %2358 = vmatpush3.bf16.xpose.msra.mxu1 %v552_v35  ;;  %v657_v39 = vpop.permute.xlu0 %656 }
 0x28c   : > { %2369 = vmatprep.subr.bf16.mxu1 %v2710_v8 }
 0x28d   : > { %v659_v36 = vpop.permute.xlu1 %658 }
 0x28e   : > { %v664_v37 = vsel %vm547_vm2, %v659_v36, 0 }
 0x291   : > { %v769_v38 = vpop.permute.xlu1 %768 }
 0x292   : > { %2360 = vmatmul.mubr.msk.bf16.vlgmr.msra.gmra.mxu1 %vm547_vm2, %v542_v32  ;;  %v774_v41 = vsel %vm547_vm2, %v769_v38, 0 }
 0x293   : > { %2370 = vmatpush3.bf16.xpose.msra.mxu1 %v664_v37  ;;  %2371 = vmatprep.mubr.msk.bf16.mxu1 %vm2711_vm1, %v2710_v8 }
 0x294   : > { %2381 = vmatprep.subr.bf16.mxu1 %v2710_v8 }
 0x295   : > { %v767_v40 = vpop.permute.xlu1 %766 }
 0x299   : > { %v879_v42 = vpop.permute.xlu1 %878 }
 0x29a   : > { %2372 = vmatmul.mubr.msk.bf16.vlgmr.msra.gmra.mxu1 %vm547_vm2, %v657_v39  ;;  %v884_v43 = vsel %vm547_vm2, %v879_v42, 0 }
 0x29b   : > { %2382 = vmatpush3.bf16.xpose.msra.mxu1 %v774_v41  ;;  %2383 = vmatprep.mubr.msk.bf16.mxu1 %vm2711_vm1, %v2710_v8 }
 0x29c   : > { %2393 = vmatprep.subr.bf16.mxu1 %v2710_v8 }
 0x29d   : > { %v877_v44 = vpop.permute.xlu1 %876 }
 0x2a2   : > { %2384 = vmatmul.mubr.msk.bf16.vlgmr.msra.gmra.mxu1 %vm547_vm2, %v767_v40 }
 0x2a3   : > { %2394 = vmatpush3.bf16.xpose.msra.mxu1 %v884_v43  ;;  %2395 = vmatprep.mubr.msk.bf16.mxu1 %vm2711_vm1, %v2710_v8 }
 0x2a4   : > { %2405 = vmatprep.subr.bf16.mxu1 %v2710_v8 }
 0x2aa   : > { %2396 = vmatmul.mubr.msk.bf16.vlgmr.msra.gmra.mxu1 %vm547_vm2, %v877_v44 }
 0x2ab   : > { %2409 = vmatprep.mubr.msk.bf16.mxu1 %vm2711_vm1, %v2710_v8 }
 0x352   : > { %v588_v46 = vpop.f32.mrf.mxu1 }
 0x353   : > { %v589_v47 = vadd.f32 %v2928_v45, %v588_v46 }
 0x354   : > { %v2361_v48 = vpop.f32.mrf.mxu1 }
 0x355   : > { %v594_v49 = vsel %vm547_vm2, %v589_v47, -inf }
 0x356   : > { %595 = vmax.xlane.f32.xlu1 %v594_v49  ;;  %v591_v50 = vpop.f32.mrf.mxu1 }
 0x358   : > { %v2362_v51 = vpop.f32.mrf.mxu1 }
 0x35a   : > { %v700_v52 = vpop.f32.mrf.mxu1 }
 0x35b   : > { %v701_v53 = vadd.f32 %v2928_v45, %v700_v52 }
 0x35c   : > { %v2373_v54 = vpop.f32.mrf.mxu1 }
 0x35d   : > { %v706_v55 = vsel %vm547_vm2, %v701_v53, -inf }
 0x35e   : > { %707 = vmax.xlane.f32.xlu0 %v706_v55  ;;  %v703_v56 = vpop.f32.mrf.mxu1 }
 0x360   : > { %v2374_v57 = vpop.f32.mrf.mxu1 }
 0x362   : > { %v810_v58 = vpop.f32.mrf.mxu1 }
 0x363   : > { %v811_v59 = vadd.f32 %v2928_v45, %v810_v58 }
 0x364   : > { %v2385_v60 = vpop.f32.mrf.mxu1 }
 0x365   : > { %v816_v61 = vsel %vm547_vm2, %v811_v59, -inf }
 0x366   : > { %817 = vmax.xlane.f32.xlu1 %v816_v61  ;;  %v813_v62 = vpop.f32.mrf.mxu1 }
 0x368   : > { %v2386_v63 = vpop.f32.mrf.mxu1 }
 0x36a   : > { %v920_v1 = vpop.f32.mrf.mxu1 }
 0x36b   : > { %v921_v2 = vadd.f32 %v2928_v45, %v920_v1 }
 0x36c   : > { %v2397_v3 = vpop.f32.mrf.mxu1 }
 0x36d   : > { %v926_v4 = vsel %vm547_vm2, %v921_v2, -inf  ;;  %v2583_v3 = vld [vmem:[%s3260_s4] sm:$0xff]  }
 0x36e   : > { %927 = vmax.xlane.f32.xlu0 %v926_v4  ;;  %v923_v5 = vpop.f32.mrf.mxu1 }
 0x370   : > { %v2398_v6 = vpop.f32.mrf.mxu1 }
 0x3df   : > { %v596_v7 = vpop.xlane.xlu1 %595 }
 0x3e0   : > { %v597_v9 = vsub.f32 %v589_v47, %v596_v7 }
 0x3e2   : > { %v598_v10 = vmul.f32 1.442695, %v597_v9 }
 0x3e4   : > { %2604 = vpow2.f32 %v598_v10 }
 0x3e7   : > { %v708_v11 = vpop.xlane.xlu0 %707 }
 0x3e8   : > { %v709_v12 = vsub.f32 %v701_v53, %v708_v11 }
 0x3ea   : > { %v710_v13 = vmul.f32 1.442695, %v709_v12 }
 0x3ec   : > { %2606 = vpow2.f32 %v710_v13 }
 0x3ef   : > { %v818_v27 = vpop.xlane.xlu1 %817 }
 0x3f0   : > { %v819_v28 = vsub.f32 %v811_v59, %v818_v27 }
 0x3f1   : > { %v2605_v18 = vpop.eup %2604 }
 0x3f2   : > { %v600_v19 = vsel %vm547_vm2, %v2605_v18, 0.0  ;;  %v820_v29 = vmul.f32 1.442695, %v819_v28 }
 0x3f3   : > { %601 = vadd.xlane.f32.xlu1 %v600_v19 }
 0x3f7   : > { %v928_v20 = vpop.xlane.xlu0 %927 }
 0x3f8   : > { %v929_v21 = vsub.f32 %v921_v2, %v928_v20  ;;  %v2582_v2 = vld [vmem:[%s3260_s4 + $0x8] sm:$0xff]  }
 0x3f9   : > { %v2607_v22 = vpop.eup %2606  ;;  %2406 = vmatpush3.bf16.msra.mxu1 %v2582_v2 }
 0x3fa   : > { %v930_v23 = vmul.f32 1.442695, %v929_v21  ;;  %v712_v24 = vsel %vm547_vm2, %v2607_v22, 0.0  ;;  %2407 = vmatprep.subr.bf16.mxu1 %v2710_v8 }
 0x3fb   : > { %713 = vadd.xlane.f32.xlu0 %v712_v24  ;;  %v1006_v24 = vsub.s32 4, %v2868_v14 }
 0x3fc   : > { %2608 = vpow2.f32 %v930_v23 }
 0x3fd   : > { %2610 = vpow2.f32 %v820_v29  ;;  %2408 = vmatpush3.bf16.msra.mxu1 %v2583_v3 }
 0x3fe   : > { %2421 = vmatprep.subr.bf16.mxu1 %v2710_v8 }
 0x404   : > { %606 = vrot.lane.b32.xlu1 %v2891_v30, %s3274_s15  ;;  %s3290_s15 = smov 96  }
 0x409   : > { %v2609_v25 = vpop.eup %2608 }
 0x40a   : > { %v932_v26 = vsel %vm547_vm2, %v2609_v25, 0.0  ;;  %v2611_v31 = vpop.eup %2610 }
 0x40b   : > { %933 = vadd.xlane.f32.xlu0 %v932_v26  ;;  %v822_v32 = vsel %vm547_vm2, %v2611_v31, 0.0 }
 0x421   : > { %718 = vrot.lane.b32.xlu0 %v2891_v30, %s3273_s16  ;;  %s3277_s16 = smov 24  }
 0x428   : > { %823 = vadd.xlane.f32.xlu1 %v822_v32 }
 0x439   : > { %828 = vrot.lane.b32.xlu1 %v2891_v30, %s3272_s18  ;;  %s3291_s18 = smov 80  }
 0x43d   : > { %938 = vrot.lane.b32.xlu1 %v2891_v30, %s3271_s19  ;;  %s3279_s19 = smov 8  }
 0x47c   : > { %v602_v33 = vpop.xlane.xlu1 %601 }
 0x47d   : > { %2612 = vrcp.f32 %v602_v33 }
 0x480   : > { %v607_v34 = vpop.permute.xlu1 %606 }
 0x481   : > { %v613_v35 = vsel %vm611_vm3, %v607_v34, 0 }
 0x482   : > { %2364 = vmatpush3.bf16.msra.mxu0 %v613_v35 }
 0x483   : > { %2375 = vmatprep.subr.bf16.mxu0 %v2710_v8 }
 0x484   : > { %v714_v36 = vpop.xlane.xlu0 %713 }
 0x485   : > { %2614 = vrcp.f32 %v714_v36 }
 0x48a   : > { %v2613_v37 = vpop.eup %2612 }
 0x48b   : > { %v604_v38 = vmul.f32 %v2613_v37, %v2605_v18 }
 0x48d   : > { %v605_v39 = vpack.c.bf16 %v604_v38, %v604_v38 }
 0x48f   : > { %2366 = vmatmul.mubr.msk.bf16.vlgmr.msra.gmra.mxu0 %vm547_vm2, %v605_v39  ;;  %v2584_v39 = vld [vmem:[%s3262_s6 + $0x8] sm:$0xff]  }
 0x490   : > { %2377 = vmatprep.mubr.msk.bf16.mxu0 %vm2711_vm1, %v2710_v8 }
 0x492   : > { %v2615_v30 = vpop.eup %2614 }
 0x493   : > { %v716_v41 = vmul.f32 %v2615_v30, %v2607_v22  ;;  %v2586_v30 = vld [vmem:[%s3264_s8 + $0x18] sm:$0xff]  }
 0x494   : > { %v934_v40 = vpop.xlane.xlu0 %933 }
 0x495   : > { %v717_v44 = vpack.c.bf16 %v716_v41, %v716_v41 }
 0x498   : > { %v719_v42 = vpop.permute.xlu0 %718 }
 0x499   : > { %v724_v43 = vsel %vm611_vm3, %v719_v42, 0 }
 0x49a   : > { %2376 = vmatpush3.bf16.msra.mxu0 %v724_v43 }
 0x49b   : > { %2387 = vmatprep.subr.bf16.mxu0 %v2710_v8 }
 0x49d   : > { %2378 = vmatmul.mubr.msk.bf16.vlgmr.msra.gmra.mxu0 %vm547_vm2, %v717_v44  ;;  %v1079_v44 = vsub.s32 2, %v2868_v14 }
 0x49e   : > { %2389 = vmatprep.mubr.msk.bf16.mxu0 %vm2711_vm1, %v2710_v8 }
 0x4b1   : > { %v824_v46 = vpop.xlane.xlu1 %823 }
 0x4b2   : > { %2616 = vrcp.f32 %v824_v46  ;;  %v1084_v46 = vsub.s32 3, %v2868_v14 }
 0x4b3   : > { %2618 = vrcp.f32 %v934_v40  ;;  %v2587_v40 = vld [vmem:[%s3264_s8 + $0x10] sm:$0xff]  }
 0x4b5   : > { %v829_v47 = vpop.permute.xlu1 %828 }
 0x4b6   : > { %v834_v48 = vsel %vm611_vm3, %v829_v47, 0  ;;  %v1080_v47 = vrot.slane %v2876_v16, %v1079_v44 }
 0x4b7   : > { %2388 = vmatpush3.bf16.msra.mxu0 %v834_v48 }
 0x4b8   : > { %2399 = vmatprep.subr.bf16.mxu0 %v2710_v8 }
 0x4b9   : > { %v939_v51 = vpop.permute.xlu1 %938 }
 0x4ba   : > { %v944_v54 = vsel %vm611_vm3, %v939_v51, 0 }
 0x4bf   : > { %v2617_v49 = vpop.eup %2616 }
 0x4c0   : > { %v826_v50 = vmul.f32 %v2617_v49, %v2611_v31  ;;  %v2619_v53 = vpop.eup %2618 }
 0x4c1   : > { %v936_v55 = vmul.f32 %v2619_v53, %v2609_v25  ;;  %v1007_v25 = vrot.slane %v2876_v16, %v1006_v24 }
 0x4c2   : > { %v827_v52 = vpack.c.bf16 %v826_v50, %v826_v50  ;;  %v1085_v50 = vrot.slane %v2876_v16, %v1084_v46 }
 0x4c3   : > { %v937_v56 = vpack.c.bf16 %v936_v55, %v936_v55  ;;  %v2589_v55 = vld [vmem:[%s3264_s8] sm:$0xff]  }
 0x4c4   : > { %2390 = vmatmul.mubr.msk.bf16.vlgmr.msra.gmra.mxu0 %vm547_vm2, %v827_v52 }
 0x4c5   : > { %2400 = vmatpush3.bf16.msra.mxu0 %v944_v54  ;;  %2401 = vmatprep.mubr.msk.bf16.mxu0 %vm2711_vm1, %v2710_v8  ;;  %v2588_v54 = vld [vmem:[%s3264_s8 + $0x8] sm:$0xff]  }
 0x4c6   : > { %2413 = vmatprep.subr.bf16.mxu0 %v2710_v8 }
 0x4cc   : > { %2402 = vmatmul.mubr.msk.bf16.vlgmr.msra.gmra.mxu0 %vm547_vm2, %v937_v56  ;;  %v2224_v56 = vld [vmem:[%s3263_s7] ss:$0 sm:$0xff] }
 0x4cd   : > { %2417 = vmatprep.mubr.msk.bf16.mxu0 %vm2711_vm1, %v2710_v8  ;;  %2414 = vmatpush3.bf16.msra.mxu0 %v2584_v39 }
 0x4ce   : > { %2415 = vmatprep.subr.bf16.mxu0 %v2710_v8 }
 0x54f   : > { %v649_v57 = vpop.f32.mrf.mxu0 }
 0x551   : > { %v2367_v58 = vpop.f32.mrf.mxu0 }
 0x553   : > { %v652_v59 = vpop.f32.mrf.mxu0 }
 0x555   : > { %v2368_v60 = vpop.f32.mrf.mxu0 }
 0x55d   : > { %v760_v61 = vpop.f32.mrf.mxu0 }
 0x55e   : > { %987 = vrot.lane.b32.xlu0 %v760_v61, %s3279_s19  ;;  %s3295_s19 = smov 104  }
 0x55f   : > { %v2379_v62 = vpop.f32.mrf.mxu0 }
 0x561   : > { %v763_v63 = vpop.f32.mrf.mxu0 }
 0x563   : > { %v2380_v1 = vpop.f32.mrf.mxu0 }
 0x564   : > { %v1153_v1 = vsub.s32 5, %v2868_v14  ;;  %v2600_v14 = vld [vmem:[%s3266_s10 + $0x8] sm:$0xff]  }
 0x566   : > { %v1154_v2 = vrot.slane %v2876_v16, %v1153_v1  ;;  %v2590_v16 = vld [vmem:[%s3288_s2 + $0x18] sm:$0xff]  }
 0x584   : > { %v870_v4 = vpop.f32.mrf.mxu0 }
 0x585   : > { %991 = vrot.lane.b32.xlu1 %v870_v4, %s3278_s26  ;;  %s3293_s26 = smov 72  }
 0x586   : > { %v2391_v5 = vpop.f32.mrf.mxu0 }
 0x588   : > { %v873_v6 = vpop.f32.mrf.mxu0 }
 0x58a   : > { %v2392_v7 = vpop.f32.mrf.mxu0 }
 0x58c   : > { %v980_v9 = vpop.f32.mrf.mxu0 }
 0x58d   : > { %995 = vrot.lane.b32.xlu0 %v980_v9, %s3277_s16  ;;  %s3297_s16 = smov 56  }
 0x58e   : > { %v2403_v10 = vpop.f32.mrf.mxu0 }
 0x590   : > { %v983_v11 = vpop.f32.mrf.mxu0 }
 0x592   : > { %v2404_v12 = vpop.f32.mrf.mxu0 }
 0x5d0   : > { %v988_v13 = vpop.permute.xlu0 %987 }
 0x5d1   : > { %v998_v19 = vsel %vm547_vm2, %v649_v57, %v988_v13 }
 0x5f7   : > { %v992_v18 = vpop.permute.xlu1 %991 }
 0x5f8   : > { %v1000_v20 = vsel %vm999_vm4, %v998_v19, %v992_v18 }
 0x5ff   : > { %v996_v21 = vpop.permute.xlu0 %995 }
 0x600   : > { %v1002_v22 = vsel %vm1001_vm5, %v1000_v20, %v996_v21  ;;  %v2591_v20 = vld [vmem:[%s3288_s2 + $0x10] sm:$0xff]  }
 0x601   : > { %v1003_v23 = vpack.c.bf16 %v1002_v22, %v1002_v22 }
 0x603   : > { %2410 = vmatmul.mubr.msk.bf16.vlgmr.msra.gmra.mxu1 %vm454_vm0, %v1003_v23 }
 0x604   : > { %2429 = vmatprep.mubr.msk.bf16.mxu1 %vm2711_vm1, %v2710_v8  ;;  %2422 = vmatpush3.bf16.msra.mxu1 %v2586_v30 }
 0x605   : > { %2423 = vmatprep.subr.bf16.mxu1 %v2710_v8 }
 0x608   : > { %2424 = vmatpush3.bf16.msra.mxu1 %v2587_v40 }
 0x609   : > { %2425 = vmatprep.subr.bf16.mxu1 %v2710_v8 }
 0x60c   : > { %2426 = vmatpush3.bf16.msra.mxu1 %v2588_v54 }
 0x60d   : > { %2427 = vmatprep.subr.bf16.mxu1 %v2710_v8 }
 0x610   : > { %2428 = vmatpush3.bf16.msra.mxu1 %v2589_v55 }
 0x611   : > { %2447 = vmatprep.subr.bf16.mxu1 %v2710_v8 }
 0x6c3   : > { %v1057_v26 = vpop.f32.mrf.mxu1 }
 0x6c4   : > { %v1058_v27 = vadd.f32 %v1057_v26, %v1007_v25  ;;  %v3056_v25 = vld [vmem:[%s3261_s5 + $0x8] sm:$0x3f] }
 0x6c5   : > { %v2411_v28 = vpop.f32.mrf.mxu1  ;;  %v1270_v26 = vrot.slane %v3056_v25, %v2871_v15 }
 0x6c6   : > { %v1063_v29 = vadd.f32 %v1058_v27, %v2848_v0  ;;  %v2585_v0 = vld [vmem:[%s3262_s6] sm:$0xff]  }
 0x6c7   : > { %v1060_v31 = vpop.f32.mrf.mxu1  ;;  %2416 = vmatpush3.bf16.msra.mxu0 %v2585_v0 }
 0x6c8   : > { %v1064_v32 = vsel %vm454_vm0, %v1063_v29, 0.0  ;;  %2433 = vmatprep.subr.bf16.mxu0 %v2710_v8 }
 0x6c9   : > { %1065 = vadd.xlane.f32.xlu1 %v1064_v32  ;;  %v2412_v33 = vpop.f32.mrf.mxu1 }
 0x752   : > { %v1066_v34 = vpop.xlane.xlu1 %1065 }
 0x753   : > { %v1067_v35 = vmul.f32 0.03125, %v1066_v34  ;;  %v2256_v34 = vld [vmem:[%s3259_s3 + $0x1] ss:$0 sm:$0xff] }
 0x755   : > { %v1068_v36 = vsub.f32 %v1063_v29, %v1067_v35 }
 0x757   : > { %v1069_v37 = vmul.f32 %v1068_v36, %v1068_v36 }
 0x759   : > { %v1070_v38 = vsel %vm454_vm0, %v1069_v37, 0.0 }
 0x75a   : > { %1071 = vadd.xlane.f32.xlu0 %v1070_v38 }
 0x7e3   : > { %v1072_v41 = vpop.xlane.xlu0 %1071 }
 0x7e4   : > { %v1073_v42 = vmul.f32 0.03125, %v1072_v41 }
 0x7e6   : > { %v1074_v43 = vadd.f32 1e-06, %v1073_v42 }
 0x7e8   : > { %2620 = vrsqrt.f32 %v1074_v43 }
 0x7f5   : > { %v2621_v48 = vpop.eup %2620 }
 0x7f6   : > { %v1076_v49 = vmul.f32 %v2621_v48, %v1068_v36 }
 0x7f8   : > { %v1081_v51 = vmul.f32 %v1080_v47, %v1076_v49 }
 0x7fa   : > { %v1086_v52 = vadd.f32 %v1085_v50, %v1081_v51 }
 0x7fc   : > { %v1087_v53 = vpack.c.bf16 %v1086_v52, %v1086_v52 }
 0x7fe   : > { %2418 = vmatmul.mubr.msk.bf16.vlgmr.msra.gmra.mxu0 %vm454_vm0, %v1087_v53 }
 0x7ff   : > { %2437 = vmatprep.mubr.msk.bf16.mxu0 %vm2711_vm1, %v2710_v8  ;;  %2434 = vmatpush3.bf16.msra.mxu0 %v2590_v16 }
 0x800   : > { %2435 = vmatprep.subr.bf16.mxu0 %v2710_v8 }
 0x803   : > { %2436 = vmatpush3.bf16.msra.mxu0 %v2591_v20 }
 0x804   : > { %2441 = vmatprep.subr.bf16.mxu0 %v2710_v8 }
 0x8be   : > { %v1143_v57 = vpop.f32.mrf.mxu0 }
 0x8bf   : > { %v1144_v58 = vadd.f32 %v2224_v56, %v1143_v57 }
 0x8c0   : > { %v2419_v59 = vpop.f32.mrf.mxu0 }
 0x8c1   : > { %v1149_v60 = vmax.f32 %v1144_v58, 0.0 }
 0x8c2   : > { %v1146_v61 = vpop.f32.mrf.mxu0 }
 0x8c3   : > { %v1150_v62 = vpack.c.bf16 %v1149_v60, %v1149_v60 }
 0x8c4   : > { %v2420_v63 = vpop.f32.mrf.mxu0 }
 0x8c5   : > { %2430 = vmatmul.mubr.msk.bf16.vlgmr.msra.gmra.mxu1 %vm1179_vm6, %v1150_v62 }
 0x8c6   : > { %2449 = vmatprep.mubr.msk.bf16.mxu1 %vm2711_vm1, %v2710_v8 }
 0x985   : > { %v1217_v3 = vpop.f32.mrf.mxu1 }
 0x986   : > { %v1218_v4 = vadd.f32 %v1217_v3, %v1154_v2 }
 0x987   : > { %v2431_v5 = vpop.f32.mrf.mxu1 }
 0x988   : > { %v3039_v6 = vadd.f32 %v1218_v4, %v1063_v29  ;;  %v1275_v29 = vrot.slane %v3056_v25, %v2879_v17 }
 0x989   : > { %v1220_v7 = vpop.f32.mrf.mxu1 }
 0x98a   : > { %v1254_v9 = vsel %vm454_vm0, %v3039_v6, 0.0 }
 0x98b   : > { %1255 = vadd.xlane.f32.xlu0 %v1254_v9  ;;  %v2432_v10 = vpop.f32.mrf.mxu1 }
 0xa14   : > { %v1256_v11 = vpop.xlane.xlu0 %1255 }
 0xa15   : > { %v1257_v12 = vmul.f32 0.03125, %v1256_v11 }
 0xa17   : > { %v1258_v13 = vsub.f32 %v3039_v6, %v1257_v12 }
 0xa19   : > { %v1259_v18 = vmul.f32 %v1258_v13, %v1258_v13 }
 0xa1b   : > { %v1260_v19 = vsel %vm454_vm0, %v1259_v18, 0.0 }
 0xa1c   : > { %1261 = vadd.xlane.f32.xlu1 %v1260_v19 }
 0xaa5   : > { %v1262_v21 = vpop.xlane.xlu1 %1261 }
 0xaa6   : > { %v1263_v22 = vmul.f32 0.03125, %v1262_v21 }
 0xaa8   : > { %v1264_v23 = vadd.f32 1e-06, %v1263_v22 }
 0xaaa   : > { %2622 = vrsqrt.f32 %v1264_v23 }
 0xab7   : > { %v2623_v27 = vpop.eup %2622 }
 0xab8   : > { %v1266_v28 = vmul.f32 %v2623_v27, %v1258_v13 }
 0xaba   : > { %v1271_v31 = vmul.f32 %v1270_v26, %v1266_v28 }
 0xabc   : > { %v1276_v32 = vadd.f32 %v1275_v29, %v1271_v31 }
 0xabe   : > { %v1277_v33 = vpack.c.bf16 %v1276_v32, %v1276_v32 }
 0xac0   : > { %2438 = vmatmul.mubr.msk.bf16.vlgmr.msra.gmra.mxu0 %vm454_vm0, %v1277_v33 }
 0xac1   : > { %2443 = vmatprep.mubr.msk.bf16.mxu0 %vm2711_vm1, %v2710_v8 }
 0xb80   : > { %v1333_v35 = vpop.f32.mrf.mxu0 }
 0xb81   : > { %v1334_v36 = vadd.f32 %v2256_v34, %v1333_v35 }
 0xb82   : > { %v2439_v37 = vpop.f32.mrf.mxu0 }
 0xb83   : > { %v1339_v38 = vmul.f32 0.35355338, %v1334_v36  ;;  %v3068_v39 = vpack.c.bf16 %v1334_v36, %v1334_v36 }
 0xb84   : > { %v1336_v0 = vpop.f32.mrf.mxu0 }
 0xb85   : > { %1454 = vrot.lane.b32.xlu1 %v3068_v39, %s2714_s28  ;;  %1343 = vrot.lane.b32.xlu0 %v3068_v39, %s3290_s15  ;;  %v1340_v40 = vpack.c.bf16 %v1339_v38, %v1339_v38  ;;  %s3296_s28 = smov 64   ;;  %s3299_s15 = smov 40  }
 0xb86   : > { %v2440_v30 = vpop.f32.mrf.mxu0 }
 0xb89   : > { %1564 = vrot.lane.b32.xlu0 %v3068_v39, %s3291_s18  ;;  %1452 = vrot.lane.b32.xlu1 %v1340_v40, %s3292_s20  ;;  %s3300_s18 = smov 8  }
 0xb8d   : > { %1674 = vrot.lane.b32.xlu0 %v3068_v39, %s3293_s26  ;;  %1562 = vrot.lane.b32.xlu1 %v1340_v40, %s3294_s29  ;;  %s413_s26 = sand.u32 1, %s2700_s22   ;;  %s2283_s29 = sshll.u32 %s2813_s25, 4 }
 0xb8e   : > { %s2654_s25 = scalar_lea.vmem %s2653_s1, 32 }
 0xb91   : > { %1672 = vrot.lane.b32.xlu1 %v1340_v40, %s3295_s19  ;;  %s414_s19 = scalar_lea.vmem [#allocation2], %s413_s26 }
 0xbf7   : > { %v1344_v41 = vpop.permute.xlu0 %1343  ;;  %v1455_v43 = vpop.permute.xlu1 %1454 }
 0xbf8   : > { %v1349_v42 = vsel %vm547_vm2, %v1344_v41, 0  ;;  %v1460_v47 = vsel %vm547_vm2, %v1455_v43, 0 }
 0xbf9   : > { %2442 = vmatpush3.bf16.xpose.msra.mxu0 %v1349_v42 }
 0xbfa   : > { %2453 = vmatprep.subr.bf16.mxu0 %v2710_v8 }
 0xbfb   : > { %v1565_v48 = vpop.permute.xlu0 %1564  ;;  %v1453_v49 = vpop.permute.xlu1 %1452 }
 0xbfc   : > { %v1570_v50 = vsel %vm547_vm2, %v1565_v48, 0 }
 0xbff   : > { %v1675_v51 = vpop.permute.xlu0 %1674  ;;  %v1563_v52 = vpop.permute.xlu1 %1562 }
 0xc00   : > { %2444 = vmatmul.mubr.msk.bf16.vlgmr.msra.gmra.mxu0 %vm547_vm2, %v1340_v40  ;;  %v1680_v53 = vsel %vm547_vm2, %v1675_v51, 0 }
 0xc01   : > { %2454 = vmatpush3.bf16.xpose.msra.mxu0 %v1460_v47  ;;  %2455 = vmatprep.mubr.msk.bf16.mxu0 %vm2711_vm1, %v2710_v8 }
 0xc02   : > { %2465 = vmatprep.subr.bf16.mxu0 %v2710_v8 }
 0xc03   : > { %v1673_v54 = vpop.permute.xlu1 %1672 }
 0xc08   : > { %2456 = vmatmul.mubr.msk.bf16.vlgmr.msra.gmra.mxu0 %vm547_vm2, %v1453_v49 }
 0xc09   : > { %2466 = vmatpush3.bf16.xpose.msra.mxu0 %v1570_v50  ;;  %2467 = vmatprep.mubr.msk.bf16.mxu0 %vm2711_vm1, %v2710_v8 }
 0xc0a   : > { %2477 = vmatprep.subr.bf16.mxu0 %v2710_v8 }
 0xc10   : > { %2468 = vmatmul.mubr.msk.bf16.vlgmr.msra.gmra.mxu0 %vm547_vm2, %v1563_v52 }
 0xc11   : > { %2478 = vmatpush3.bf16.xpose.msra.mxu0 %v1680_v53  ;;  %2479 = vmatprep.mubr.msk.bf16.mxu0 %vm2711_vm1, %v2710_v8 }
 0xc12   : > { %2489 = vmatprep.subr.bf16.mxu0 %v2710_v8 }
 0xc18   : > { %2480 = vmatmul.mubr.msk.bf16.vlgmr.msra.gmra.mxu0 %vm547_vm2, %v1673_v54 }
 0xc19   : > { %2493 = vmatprep.mubr.msk.bf16.mxu0 %vm2711_vm1, %v2710_v8 }
 0xcc0   : > { %v1385_v55 = vpop.f32.mrf.mxu0 }
 0xcc1   : > { %v1386_v56 = vadd.f32 %v2928_v45, %v1385_v55 }
 0xcc2   : > { %v2445_v57 = vpop.f32.mrf.mxu0 }
 0xcc3   : > { %v1391_v58 = vsel %vm547_vm2, %v1386_v56, -inf }
 0xcc4   : > { %1392 = vmax.xlane.f32.xlu0 %v1391_v58  ;;  %v1388_v59 = vpop.f32.mrf.mxu0 }
 0xcc6   : > { %v2446_v60 = vpop.f32.mrf.mxu0 }
 0xcc8   : > { %v1496_v61 = vpop.f32.mrf.mxu0 }
 0xcc9   : > { %v1497_v62 = vadd.f32 %v2928_v45, %v1496_v61 }
 0xcca   : > { %v2457_v63 = vpop.f32.mrf.mxu0 }
 0xccb   : > { %v1502_v2 = vsel %vm547_vm2, %v1497_v62, -inf }
 0xccc   : > { %1503 = vmax.xlane.f32.xlu1 %v1502_v2  ;;  %v1499_v3 = vpop.f32.mrf.mxu0 }
 0xcce   : > { %v2458_v4 = vpop.f32.mrf.mxu0 }
 0xcd0   : > { %v1606_v5 = vpop.f32.mrf.mxu0 }
 0xcd1   : > { %v1607_v7 = vadd.f32 %v2928_v45, %v1606_v5 }
 0xcd2   : > { %v2469_v9 = vpop.f32.mrf.mxu0 }
 0xcd3   : > { %v1612_v10 = vsel %vm547_vm2, %v1607_v7, -inf }
 0xcd4   : > { %1613 = vmax.xlane.f32.xlu0 %v1612_v10  ;;  %v1609_v11 = vpop.f32.mrf.mxu0 }
 0xcd6   : > { %v2470_v12 = vpop.f32.mrf.mxu0 }
 0xcd8   : > { %v1716_v13 = vpop.f32.mrf.mxu0 }
 0xcd9   : > { %v1717_v18 = vadd.f32 %v2928_v45, %v1716_v13 }
 0xcda   : > { %v2481_v19 = vpop.f32.mrf.mxu0 }
 0xcdb   : > { %v1722_v16 = vsel %vm547_vm2, %v1717_v18, -inf }
 0xcdc   : > { %1723 = vmax.xlane.f32.xlu0 %v1722_v16  ;;  %v1719_v20 = vpop.f32.mrf.mxu0 }
 0xcdd   : > { %v2592_v20 = vld [vmem:[%s3260_s4 + $0x18] sm:$0xff]  }
 0xcde   : > { %v2482_v21 = vpop.f32.mrf.mxu0  ;;  %2490 = vmatpush3.bf16.msra.mxu0 %v2592_v20 }
 0xcdf   : > { %2491 = vmatprep.subr.bf16.mxu0 %v2710_v8  ;;  %v2593_v21 = vld [vmem:[%s3260_s4 + $0x10] sm:$0xff]  }
 0xce2   : > { %2492 = vmatpush3.bf16.msra.mxu0 %v2593_v21 }
 0xce3   : > { %2505 = vmatprep.subr.bf16.mxu0 %v2710_v8 }
 0xd4d   : > { %v1393_v22 = vpop.xlane.xlu0 %1392 }
 0xd4e   : > { %v1394_v23 = vsub.f32 %v1386_v56, %v1393_v22 }
 0xd50   : > { %v1395_v26 = vmul.f32 1.442695, %v1394_v23 }
 0xd52   : > { %2624 = vpow2.f32 %v1395_v26 }
 0xd55   : > { %v1504_v27 = vpop.xlane.xlu1 %1503 }
 0xd56   : > { %v1505_v28 = vsub.f32 %v1497_v62, %v1504_v27 }
 0xd58   : > { %v1506_v29 = vmul.f32 1.442695, %v1505_v28 }
 0xd5a   : > { %2626 = vpow2.f32 %v1506_v29 }
 0xd5d   : > { %v1614_v33 = vpop.xlane.xlu0 %1613 }
 0xd5e   : > { %v1615_v30 = vsub.f32 %v1607_v7, %v1614_v33 }
 0xd5f   : > { %v2625_v31 = vpop.eup %2624 }
 0xd60   : > { %v1397_v32 = vsel %vm547_vm2, %v2625_v31, 0.0  ;;  %v1616_v40 = vmul.f32 1.442695, %v1615_v30 }
 0xd61   : > { %1398 = vadd.xlane.f32.xlu1 %v1397_v32 }
 0xd65   : > { %v1724_v45 = vpop.xlane.xlu0 %1723 }
 0xd66   : > { %v1725_v34 = vsub.f32 %v1717_v18, %v1724_v45 }
 0xd67   : > { %v2627_v35 = vpop.eup %2626 }
 0xd68   : > { %v1726_v36 = vmul.f32 1.442695, %v1725_v34  ;;  %v1508_v37 = vsel %vm547_vm2, %v2627_v35, 0.0 }
 0xd69   : > { %1509 = vadd.xlane.f32.xlu0 %v1508_v37 }
 0xd6a   : > { %2628 = vpow2.f32 %v1726_v36 }
 0xd6b   : > { %2630 = vpow2.f32 %v1616_v40 }
 0xd72   : > { %1403 = vrot.lane.b32.xlu1 %v3068_v39, %s3296_s28  ;;  %s3301_s28 = smov 16  }
 0xd77   : > { %v2629_v38 = vpop.eup %2628 }
 0xd78   : > { %v1728_v0 = vsel %vm547_vm2, %v2629_v38, 0.0  ;;  %v2631_v41 = vpop.eup %2630 }
 0xd79   : > { %1729 = vadd.xlane.f32.xlu0 %v1728_v0  ;;  %v1618_v42 = vsel %vm547_vm2, %v2631_v41, 0.0  ;;  %v1801_v0 = vrot.slane %v3056_v25, %v1006_v24  ;;  %v2594_v24 = vld [vmem:[%s3262_s6 + $0x18] sm:$0xff]  }
 0xd8f   : > { %1514 = vrot.lane.b32.xlu0 %v3068_v39, %s3297_s16  ;;  %s3302_s16 = smov 24  }
 0xd96   : > { %1619 = vadd.xlane.f32.xlu1 %v1618_v42 }
 0xda7   : > { %1624 = vrot.lane.b32.xlu1 %v3068_v39, %s3298_s17 }
 0xdab   : > { %1734 = vrot.lane.b32.xlu1 %v3068_v39, %s3299_s15  ;;  %s2137_s15 = scalar_lea.hbm %s3268_s12, %s2283_s29 }
 0xdea   : > { %v1399_v43 = vpop.xlane.xlu1 %1398 }
 0xdeb   : > { %2632 = vrcp.f32 %v1399_v43 }
 0xdee   : > { %v1404_v47 = vpop.permute.xlu1 %1403 }
 0xdef   : > { %v1409_v48 = vsel %vm611_vm3, %v1404_v47, 0 }
 0xdf0   : > { %2448 = vmatpush3.bf16.msra.mxu1 %v1409_v48 }
 0xdf1   : > { %2459 = vmatprep.subr.bf16.mxu1 %v2710_v8 }
 0xdf2   : > { %v1510_v49 = vpop.xlane.xlu0 %1509 }
 0xdf3   : > { %2634 = vrcp.f32 %v1510_v49 }
 0xdf8   : > { %v2633_v50 = vpop.eup %2632 }
 0xdf9   : > { %v1401_v51 = vmul.f32 %v2633_v50, %v2625_v31 }
 0xdfb   : > { %v1402_v52 = vpack.c.bf16 %v1401_v51, %v1401_v51 }
 0xdfd   : > { %2450 = vmatmul.mubr.msk.bf16.vlgmr.msra.gmra.mxu1 %vm547_vm2, %v1402_v52 }
 0xdfe   : > { %2461 = vmatprep.mubr.msk.bf16.mxu1 %vm2711_vm1, %v2710_v8 }
 0xe00   : > { %v2635_v53 = vpop.eup %2634 }
 0xe01   : > { %v1512_v54 = vmul.f32 %v2635_v53, %v2627_v35 }
 0xe02   : > { %v1730_v39 = vpop.xlane.xlu0 %1729 }
 0xe03   : > { %v1513_v57 = vpack.c.bf16 %v1512_v54, %v1512_v54  ;;  %v2597_v54 = vld [vmem:[%s3264_s8 + $0x30] sm:$0xff]  }
 0xe06   : > { %v1515_v55 = vpop.permute.xlu0 %1514 }
 0xe07   : > { %v1520_v56 = vsel %vm611_vm3, %v1515_v55, 0 }
 0xe08   : > { %2460 = vmatpush3.bf16.msra.mxu1 %v1520_v56 }
 0xe09   : > { %2471 = vmatprep.subr.bf16.mxu1 %v2710_v8 }
 0xe0b   : > { %2462 = vmatmul.mubr.msk.bf16.vlgmr.msra.gmra.mxu1 %vm547_vm2, %v1513_v57 }
 0xe0c   : > { %2473 = vmatprep.mubr.msk.bf16.mxu1 %vm2711_vm1, %v2710_v8 }
 0xe1f   : > { %v1620_v58 = vpop.xlane.xlu1 %1619 }
 0xe20   : > { %2636 = vrcp.f32 %v1620_v58  ;;  %v1874_v58 = vrot.slane %v3056_v25, %v1079_v44  ;;  %v2599_v44 = vld [vmem:[%s3264_s8 + $0x20] sm:$0xff]  }
 0xe21   : > { %2638 = vrcp.f32 %v1730_v39  ;;  %v2596_v39 = vld [vmem:[%s3264_s8 + $0x38] sm:$0xff]  }
 0xe23   : > { %v1625_v59 = vpop.permute.xlu1 %1624 }
 0xe24   : > { %v1630_v60 = vsel %vm611_vm3, %v1625_v59, 0 }
 0xe25   : > { %2472 = vmatpush3.bf16.msra.mxu1 %v1630_v60 }
 0xe26   : > { %2483 = vmatprep.subr.bf16.mxu1 %v2710_v8 }
 0xe27   : > { %v1735_v63 = vpop.permute.xlu1 %1734 }
 0xe28   : > { %v1740_v4 = vsel %vm611_vm3, %v1735_v63, 0 }
 0xe2d   : > { %v2637_v61 = vpop.eup %2636 }
 0xe2e   : > { %v1622_v62 = vmul.f32 %v2637_v61, %v2631_v41  ;;  %v2639_v3 = vpop.eup %2638  ;;  %v1879_v61 = vrot.slane %v3056_v25, %v1084_v46  ;;  %v2271_v46 = vld [vmem:[%s3263_s7 + $0x1] ss:$0 sm:$0xff] }
 0xe2f   : > { %v1732_v5 = vmul.f32 %v2639_v3, %v2629_v38  ;;  %v2598_v3 = vld [vmem:[%s3264_s8 + $0x28] sm:$0xff]  }
 0xe30   : > { %v1623_v2 = vpack.c.bf16 %v1622_v62, %v1622_v62 }
 0xe31   : > { %v1733_v7 = vpack.c.bf16 %v1732_v5, %v1732_v5 }
 0xe32   : > { %2474 = vmatmul.mubr.msk.bf16.vlgmr.msra.gmra.mxu1 %vm547_vm2, %v1623_v2 }
 0xe33   : > { %2484 = vmatpush3.bf16.msra.mxu1 %v1740_v4  ;;  %2485 = vmatprep.mubr.msk.bf16.mxu1 %vm2711_vm1, %v2710_v8 }
 0xe34   : > { %2497 = vmatprep.subr.bf16.mxu1 %v2710_v8 }
 0xe3a   : > { %2486 = vmatmul.mubr.msk.bf16.vlgmr.msra.gmra.mxu1 %vm547_vm2, %v1733_v7 }
 0xe3b   : > { %2501 = vmatprep.mubr.msk.bf16.mxu1 %vm2711_vm1, %v2710_v8  ;;  %2498 = vmatpush3.bf16.msra.mxu1 %v2594_v24 }
 0xe3c   : > { %2499 = vmatprep.subr.bf16.mxu1 %v2710_v8 }
 0xebd   : > { %v1445_v9 = vpop.f32.mrf.mxu1 }
 0xebf   : > { %v2451_v10 = vpop.f32.mrf.mxu1 }
 0xec1   : > { %v1448_v11 = vpop.f32.mrf.mxu1 }
 0xec3   : > { %v2452_v12 = vpop.f32.mrf.mxu1 }
 0xecb   : > { %v1556_v13 = vpop.f32.mrf.mxu1 }
 0xecc   : > { %1783 = vrot.lane.b32.xlu0 %v1556_v13, %s3300_s18  ;;  %v1948_v13 = vrot.slane %v3056_v25, %v1153_v1  ;;  %v2601_v1 = vld [vmem:[%s3266_s10] sm:$0xff]   ;;  %s2127_s18 = scalar_lea.sflag [#allocation3], %s413_s26 }
 0xecd   : > { %v2463_v18 = vpop.f32.mrf.mxu1 }
 0xecf   : > { %v1559_v19 = vpop.f32.mrf.mxu1 }
 0xed1   : > { %v2464_v16 = vpop.f32.mrf.mxu1 }
 0xef2   : > { %v1666_v22 = vpop.f32.mrf.mxu1 }
 0xef3   : > { %1787 = vrot.lane.b32.xlu1 %v1666_v22, %s3301_s28  ;;  %s2139_s28 = sshll.u32 %s414_s19, 4  ;;  %s2140_s28 = int_to_ptr.vmem [resolvable:$true] %s2139_s28 }
 0xef4   : > { %v2475_v23 = vpop.f32.mrf.mxu1  ;;  %s2648_s20 = scalar_lea.vmem %s2140_s28, 16  ;;  %p2655_p0 = scmp.lt.s32.totalorder %s2140_s28, %s2653_s1 }
 0xef5   : > { %p2649_p11 = scmp.ne.s32.totalorder %s2140_s28, %s2648_s20  ;;  %p2656_p1 = scmp.lt.s32.totalorder %s2654_s25, %s2648_s20 }
 0xef6   : > { %v1669_v26 = vpop.f32.mrf.mxu1 }
 0xef7   : > { %p2650_p12 = pnand %p2649_p11, %p2830_p5  ;;  %p2657_p2 = por %p2656_p1, %p2655_p0 }
 0xef8   : > { %v2476_v27 = vpop.f32.mrf.mxu1 }
 0xef9   : > { %p2651_p13 = pneg %p2650_p12 }
 0xefa   : > { %v1776_v28 = vpop.f32.mrf.mxu1 }
 0xefb   : > { %1791 = vrot.lane.b32.xlu0 %v1776_v28, %s3302_s16  ;;  %p2658_p3 = pnand %p2657_p2, %p2651_p13 }
 0xefc   : > { %v2487_v29 = vpop.f32.mrf.mxu1 }
 0xefe   : > { %v1779_v31 = vpop.f32.mrf.mxu1 }
 0xf00   : > { %v2488_v32 = vpop.f32.mrf.mxu1 }
 0xf3e   : > { %v1784_v33 = vpop.permute.xlu0 %1783 }
 0xf3f   : > { %v1794_v34 = vsel %vm547_vm2, %v1445_v9, %v1784_v33 }
 0xf65   : > { %v1788_v45 = vpop.permute.xlu1 %1787 }
 0xf66   : > { %v1795_v35 = vsel %vm999_vm4, %v1794_v34, %v1788_v45  ;;  %v2017_v45 = vld [vmem:[%s3265_s9] sm:$0x3] }
 0xf67   : > { %v2034_v34 = vrot.slane %v2017_v45, %v2871_v15  ;;  %v2055_v15 = vld [vmem:[%s3267_s11] sm:$0x1] }
 0xf6d   : > { %v1792_v36 = vpop.permute.xlu0 %1791 }
 0xf6e   : > { %v1796_v37 = vsel %vm1001_vm5, %v1795_v35, %v1792_v36  ;;  %v2039_v36 = vrot.slane %v2017_v45, %v2879_v17 }
 0xf6f   : > { %v1797_v38 = vpack.c.bf16 %v1796_v37, %v1796_v37 }
 0xf71   : > { %2494 = vmatmul.mubr.msk.bf16.vlgmr.msra.gmra.mxu0 %vm454_vm0, %v1797_v38 }
 0xf72   : > { %2513 = vmatprep.mubr.msk.bf16.mxu0 %vm2711_vm1, %v2710_v8  ;;  %2506 = vmatpush3.bf16.msra.mxu0 %v2596_v39 }
 0xf73   : > { %2507 = vmatprep.subr.bf16.mxu0 %v2710_v8 }
 0xf76   : > { %2508 = vmatpush3.bf16.msra.mxu0 %v2597_v54 }
 0xf77   : > { %2509 = vmatprep.subr.bf16.mxu0 %v2710_v8 }
 0xf7a   : > { %2510 = vmatpush3.bf16.msra.mxu0 %v2598_v3 }
 0xf7b   : > { %2511 = vmatprep.subr.bf16.mxu0 %v2710_v8 }
 0xf7e   : > { %2512 = vmatpush3.bf16.msra.mxu0 %v2599_v44 }
0x1031   : > { %v1851_v30 = vpop.f32.mrf.mxu0 }
0x1032   : > { %v1852_v40 = vadd.f32 %v1851_v30, %v1801_v0 }
0x1033   : > { %v2495_v41 = vpop.f32.mrf.mxu0 }
0x1034   : > { %v1857_v42 = vadd.f32 %v1852_v40, %v3039_v6  ;;  %v2595_v6 = vld [vmem:[%s3262_s6 + $0x10] sm:$0xff]  }
0x1035   : > { %v1854_v43 = vpop.f32.mrf.mxu0  ;;  %2500 = vmatpush3.bf16.msra.mxu1 %v2595_v6 }
0x1036   : > { %v1858_v47 = vsel %vm454_vm0, %v1857_v42, 0.0  ;;  %2517 = vmatprep.subr.bf16.mxu1 %v2710_v8 }
0x1037   : > { %1859 = vadd.xlane.f32.xlu1 %v1858_v47  ;;  %v2496_v48 = vpop.f32.mrf.mxu0 }
0x10c0   : > { %v1860_v49 = vpop.xlane.xlu1 %1859 }
0x10c1   : > { %v1861_v50 = vmul.f32 0.03125, %v1860_v49 }
0x10c3   : > { %v1862_v51 = vsub.f32 %v1857_v42, %v1861_v50 }
0x10c5   : > { %v1863_v52 = vmul.f32 %v1862_v51, %v1862_v51 }
0x10c7   : > { %v1864_v53 = vsel %vm454_vm0, %v1863_v52, 0.0 }
0x10c8   : > { %1865 = vadd.xlane.f32.xlu0 %v1864_v53 }
0x1151   : > { %v1866_v55 = vpop.xlane.xlu0 %1865 }
0x1152   : > { %v1867_v56 = vmul.f32 0.03125, %v1866_v55 }
0x1154   : > { %v1868_v57 = vadd.f32 1e-06, %v1867_v56 }
0x1156   : > { %2640 = vrsqrt.f32 %v1868_v57 }
0x1163   : > { %v2641_v59 = vpop.eup %2640 }
0x1164   : > { %v1870_v60 = vmul.f32 %v2641_v59, %v1862_v51 }
0x1166   : > { %v1875_v62 = vmul.f32 %v1874_v58, %v1870_v60 }
0x1168   : > { %v1880_v63 = vadd.f32 %v1879_v61, %v1875_v62 }
0x116a   : > { %v1881_v2 = vpack.c.bf16 %v1880_v63, %v1880_v63 }
0x116c   : > { %2502 = vmatmul.mubr.msk.bf16.vlgmr.msra.gmra.mxu1 %vm454_vm0, %v1881_v2 }
0x116d   : > { %2521 = vmatprep.mubr.msk.bf16.mxu1 %vm2711_vm1, %v2710_v8  ;;  %2518 = vmatpush3.bf16.msra.mxu1 %v2600_v14 }
0x116e   : > { %2519 = vmatprep.subr.bf16.mxu1 %v2710_v8 }
0x1171   : > { %2520 = vmatpush3.bf16.msra.mxu1 %v2601_v1 }
0x122c   : > { %v1937_v4 = vpop.f32.mrf.mxu1 }
0x122d   : > { %v1938_v5 = vadd.f32 %v2271_v46, %v1937_v4 }
0x122e   : > { %v2503_v7 = vpop.f32.mrf.mxu1 }
0x122f   : > { %v1943_v9 = vmax.f32 %v1938_v5, 0.0 }
0x1230   : > { %v1940_v10 = vpop.f32.mrf.mxu1 }
0x1231   : > { %v1944_v11 = vpack.c.bf16 %v1943_v9, %v1943_v9 }
0x1232   : > { %v2504_v12 = vpop.f32.mrf.mxu1 }
0x1233   : > { %2514 = vmatmul.mubr.msk.bf16.vlgmr.msra.gmra.mxu0 %vm1179_vm6, %v1944_v11 }
0x12f3   : > { %v2010_v18 = vpop.f32.mrf.mxu0 }
0x12f4   : > { %v2011_v19 = vadd.f32 %v2010_v18, %v1948_v13 }
0x12f5   : > { %v2515_v16 = vpop.f32.mrf.mxu0 }
0x12f6   : > { %v2016_v20 = vadd.f32 %v2011_v19, %v1857_v42 }
0x12f7   : > { %v2013_v21 = vpop.f32.mrf.mxu0 }
0x12f8   : > { %v2018_v22 = vsel %vm454_vm0, %v2016_v20, 0.0 }
0x12f9   : > { %2019 = vadd.xlane.f32.xlu0 %v2018_v22  ;;  %v2516_v23 = vpop.f32.mrf.mxu0 }
0x1382   : > { %v2020_v26 = vpop.xlane.xlu0 %2019 }
0x1383   : > { %v2021_v27 = vmul.f32 0.03125, %v2020_v26 }
0x1385   : > { %v2022_v28 = vsub.f32 %v2016_v20, %v2021_v27 }
0x1387   : > { %v2023_v29 = vmul.f32 %v2022_v28, %v2022_v28 }
0x1389   : > { %v2024_v31 = vsel %vm454_vm0, %v2023_v29, 0.0 }
0x138a   : > { %2025 = vadd.xlane.f32.xlu1 %v2024_v31 }
0x1413   : > { %v2026_v25 = vpop.xlane.xlu1 %2025 }
0x1414   : > { %v2027_v32 = vmul.f32 0.03125, %v2026_v25 }
0x1416   : > { %v2028_v33 = vadd.f32 1e-06, %v2027_v32 }
0x1418   : > { %2642 = vrsqrt.f32 %v2028_v33 }
0x1425   : > { %v2643_v35 = vpop.eup %2642 }
0x1426   : > { %v2030_v37 = vmul.f32 %v2643_v35, %v2022_v28 }
0x1428   : > { %v2035_v38 = vmul.f32 %v2034_v34, %v2030_v37 }
0x142a   : > { %v2040_v0 = vadd.f32 %v2039_v36, %v2035_v38 }
0x142c   : > { %v2041_v30 = vsel %vm454_vm0, %v2040_v0, 0.0 }
0x142d   : > { %v2042_v8 = vrot.slane %v2041_v30, 4 }
0x142f   : > { %v2043_v40 = vadd.f32 %v2042_v8, %v2041_v30 }
0x1431   : > { %v2044_v41 = vrot.slane %v2043_v40, 2 }
0x1433   : > { %v2045_v42 = vadd.f32 %v2044_v41, %v2043_v40 }
0x1435   : > { %v2046_v43 = vrot.slane %v2045_v42, 1 }
0x1437   : > { %v2047_v47 = vadd.f32 %v2046_v43, %v2045_v42 }
0x1439   : > { %v2049_v48 = vmul.f32 0.125, %v2047_v47 }
0x143b   : > { %v2050_v49 = vpack.c.bf16 %v2049_v48, %v2049_v48 }
0x143d   : > { %2522 = vmatmul.mubr.msk.bf16.vlgmr.msra.gmra.mxu1 %vm454_vm0, %v2050_v49 }
0x14fd   : > { %v2105_v17 = vpop.f32.mrf.mxu1 }
0x14fe   : > { %v2106_v50 = vadd.f32 %v2105_v17, %v2055_v15 }
0x14ff   : > { %v2523_v51 = vpop.f32.mrf.mxu1 }
0x1500   : > { %v2112_v52 = vsel %vm2111_vm7, %v2106_v50, -inf }
0x1501   : > { %2113 = vmax.xlane.f32.xlu0 %v2112_v52  ;;  %v2108_v53 = vpop.f32.mrf.mxu1 }
0x1503   : > { %v2524_v24 = vpop.f32.mrf.mxu1 }
0x158a   : > { %v2114_v6 = vpop.xlane.xlu0 %2113 }
0x158b   : > { %v2115_v39 = vsub.f32 %v2106_v50, %v2114_v6 }
0x158d   : > { %v2116_v54 = vmul.f32 1.442695, %v2115_v39 }
0x158f   : > { %2644 = vpow2.f32 %v2116_v54 }
0x159c   : > { %v2645_v55 = vpop.eup %2644 }
0x159d   : > { %v2118_v56 = vsel %vm2111_vm7, %v2645_v55, 0.0 }
0x159e   : > { %2119 = vadd.xlane.f32.xlu1 %v2118_v56 }
0x1627   : > { %v2120_v57 = vpop.xlane.xlu1 %2119 }
0x1628   : > { %2646 = vlog2.f32 %v2120_v57 }
0x1635   : > { %v2647_v58 = vpop.eup %2646 }
0x1636   : > { %v2122_v59 = vmul.f32 0.6931472, %v2647_v58 }
0x1638   : > { %v2123_v60 = vadd.f32 %v2122_v59, %v2114_v6 }
0x163a   : > { %v2124_v61 = vsub.f32 %v2106_v50, %v2123_v60 }
0x163c   : > { %2125 = vst [vmem:[%s414_s19] sm:$0x1] %v2124_v61 }
0x163d   : > { %2661 = shalt.err (!%p2658_p3)
}
0x163e   : > { %s2662_s2 = scalar_lea.hbm %s2137_s15, 16  ;;  %s2666_s19 = scalar_lea.hbm %s3268_s12, 32 }
0x163f   : > { %p2663_p4 = scmp.ne.s32.totalorder %s2137_s15, %s2662_s2  ;;  %p2667_p9 = scmp.lt.s32.totalorder %s2137_s15, %s3268_s12 }
0x1640   : > { %p2668_p10 = scmp.lt.s32.totalorder %s2666_s19, %s2662_s2 }
0x1641   : > { %p2664_p7 = pnand %p2663_p4, %p2830_p5 }
0x1642   : > { %p2669_p11 = por %p2668_p10, %p2667_p9 }
0x1643   : > { %p2665_p8 = pneg %p2664_p7 }
0x1645   : > { %p2670_p12 = pnand %p2669_p11, %p2665_p8 }
0x1647   : > { %2673 = shalt.err (!%p2670_p12)
}
0x1648   : > { %2525 = dma.vmem_to_hbm [thread:$0]  (%p2830_p5), %s2140_s28, 16, %s2137_s15, %s2127_s18  }
0x1649 PF: > { %p2531_p13 = scmp.ge.s32.totalorder %s2708_s24, 2  ;;  %s2151_s0 = sand.u32 1, %s2696_s21  }
0x164a   : > { %s2152_s1 = scalar_lea.sflag [#allocation3], %s2151_s0 }
0x164b   : > { %p2528_p0 = pnand %p2531_p13, %p2834_p6 }
0x164d   : > { %p2529_p1 = pneg %p2528_p0 }
0x164f   : > { %2691 = dma.done.wait (%p2529_p1), %s2152_s1, 16  }
0x1650   : > { %2693 = vsyncadd (%p2529_p1), %s2152_s1, 4294967280  ;;  %p22_p2 = scmp.ge.s32.totalorder %s2817_s27, 4   ;;  %s3303_s21 = smov %s2700_s22 }
0x1651   : > { %s3304_s22 = smov %s2704_s23  ;;  %s3305_s23 = smov %s2828_s30 }
0x1652   : > { %s3306_s24 = smov %s2817_s27  ;;  %24 = sbr.rel (!%p22_p2) target bundleno = 7 (0x7), region = 113 }
0x1657   :  { %2156 = vsyncpa [#allocation3], 1 }
0x1658   :  { %2158 = vsyncpa [#allocation3 + $0x1], 1 }

</bundles_post_ra>
